<compile_context>
chip_gen: v7x
topology: tpu7x:2x2x1
jax: 0.10.0
libtpu: 0.0.40
codegen_flags: <defaults>
</compile_context>

<pallas_src>
import functools

import jax
import jax.numpy as jnp
from jax.experimental import pallas as pl
from jax.experimental.pallas import tpu as pltpu


def _round_up(v, m):
    return (v + m - 1) // m * m


def _oab_kernel(kc_real, n_real, block_n,
                x_ref, p_ref,
                w1_ref, b1_ref, w2_ref, b2_ref,
                wk_ref, wv_ref, wu_ref, bu_ref,
                o_ref,
                m_scr, s_scr, k_scr, v_scr):
    pass_id = pl.program_id(1)
    tile_id = pl.program_id(2)

    # Per-batch init: reset softmax accumulators and project the proxy once.
    @pl.when(jnp.logical_and(pass_id == 0, tile_id == 0))
    def _():
        m_scr[...] = jnp.full_like(m_scr, -1e30)
        s_scr[...] = jnp.zeros_like(s_scr)
        pr = p_ref[0]                                               # (Mp, Cp) bf16
        k_scr[...] = jnp.dot(pr, wk_ref[...],
                             preferred_element_type=jnp.float32).astype(k_scr.dtype)
        v_scr[...] = jnp.dot(pr, wv_ref[...],
                             preferred_element_type=jnp.float32).astype(v_scr.dtype)

    # f_pixel on this pixel tile (recomputed per pass, flash-style; BN folded).
    x = x_ref[0]                                                    # (TN, Cp) bf16
    q = jnp.dot(x, w1_ref[...], preferred_element_type=jnp.float32) + b1_ref[...]
    q = jnp.maximum(q, 0.0).astype(jnp.bfloat16)
    q = jnp.dot(q, w2_ref[...], preferred_element_type=jnp.float32) + b2_ref[...]
    q = jnp.maximum(q, 0.0).astype(jnp.bfloat16)                    # (TN, Kp)

    # sim = (q @ k^T) * Kc^-0.5 ; contraction on the key-channel axis, no transpose.
    sim = jax.lax.dot_general(q, k_scr[...], (((1,), (1,)), ((), ())),
                              preferred_element_type=jnp.float32)   # (TN, Mp) f32
    sim = sim * (float(kc_real) ** -0.5)

    @pl.when(pass_id == 0)
    def _():
        # Online per-object (per-column) max / sum-of-exp over the pixel axis.
        new_max = jnp.maximum(m_scr[...], jnp.max(sim, axis=0, keepdims=True))
        e = jnp.exp(sim - new_max)
        if n_real % block_n != 0:
            # Mask the zero-padded pixel rows of the last tile out of the sum.
            rows = tile_id * block_n + jax.lax.broadcasted_iota(
                jnp.int32, (block_n, 1), 0)
            e = jnp.where(rows < n_real, e, 0.0)
        s_scr[...] = (s_scr[...] * jnp.exp(m_scr[...] - new_max)
                      + jnp.sum(e, axis=0, keepdims=True))
        m_scr[...] = new_max

    @pl.when(pass_id == 1)
    def _():
        # softmax over pixels (global per-object max / sum), context, f_up (+BN+ReLU).
        p_soft = jnp.exp(sim - m_scr[...]) * pl.reciprocal(s_scr[...], approx=True)
        ctx = jnp.dot(p_soft.astype(jnp.bfloat16), v_scr[...],
                      preferred_element_type=jnp.float32)           # (TN, Kp)
        out = jnp.dot(ctx.astype(jnp.bfloat16), wu_ref[...],
                      preferred_element_type=jnp.float32) + bu_ref[...]
        o_ref[0] = jnp.maximum(out, 0.0).astype(o_ref.dtype)


@functools.partial(jax.jit, static_argnames=("key_channels", "block_n"))
def object_attention_block(x, proxy, params, *, key_channels, block_n=1024):
    """x: (B, Cin, H, W); proxy: (B, Cin, Hp, Wp); returns (B, Cin, H, W) float32."""
    B, Cin, H, W = x.shape
    _, _, Hp, Wp = proxy.shape
    N, M, Kc = H * W, Hp * Wp, key_channels
    (w1, b1, w2, b2, wk, wv, wup, bup) = params

    # Padded sizes: lane axes (channels / objects) -> multiples of 128 (lane-dense
    # vregs and unmasked output stores); pixel axis -> multiple of the tile size.
    Cp = _round_up(Cin, 128)
    Kp = _round_up(Kc, 128)
    Mp = _round_up(M, 128)
    TN = _round_up(min(block_n, _round_up(N, 16)), 16)
    Np = _round_up(N, TN)
    n_tiles = Np // TN

    f32, bf16 = jnp.float32, jnp.bfloat16

    # NCHW -> (B, pixels, channels); zero-pad; bf16 inputs halve DMA + feed the MXU.
    xf = jnp.transpose(x.reshape(B, Cin, N), (0, 2, 1)).astype(f32)
    pf = jnp.transpose(proxy.reshape(B, Cin, M), (0, 2, 1)).astype(f32)
    xf = jnp.pad(xf, ((0, 0), (0, Np - N), (0, Cp - Cin))).astype(bf16)
    pf = jnp.pad(pf, ((0, 0), (0, Mp - M), (0, Cp - Cin))).astype(bf16)

    # Pre-transpose + zero-pad weights once in the wrapper (no in-kernel .T).
    w1t = jnp.pad(w1, ((0, Kp - Kc), (0, Cp - Cin))).T.astype(bf16)    # (Cp, Kp)
    w2t = jnp.pad(w2, ((0, Kp - Kc), (0, Kp - Kc))).T.astype(bf16)     # (Kp, Kp)
    wkt = jnp.pad(wk, ((0, Kp - Kc), (0, Cp - Cin))).T.astype(bf16)    # (Cp, Kp)
    wvt = jnp.pad(wv, ((0, Kp - Kc), (0, Cp - Cin))).T.astype(bf16)    # (Cp, Kp)
    wut = jnp.pad(wup, ((0, Cp - Cin), (0, Kp - Kc))).T.astype(bf16)   # (Kp, Cp)
    b1p = jnp.pad(b1.reshape(1, -1), ((0, 0), (0, Kp - Kc))).astype(f32)
    b2p = jnp.pad(b2.reshape(1, -1), ((0, 0), (0, Kp - Kc))).astype(f32)
    bup_p = jnp.pad(bup.reshape(1, -1), ((0, 0), (0, Cp - Cin))).astype(f32)

    kernel = functools.partial(_oab_kernel, Kc, N, TN)
    wspec = lambda shape: pl.BlockSpec(shape, lambda b, p, t: (0,) * len(shape))

    flops = 2 * B * (2 * Np * (Cp * Kp + Kp * Kp + Kp * Mp)     # f_pixel + sim (2 passes)
                     + Np * (Mp * Kp + Kp * Cp)                 # ctx + f_up (pass 1)
                     + 2 * Mp * Cp * Kp)                        # key/value projections
    bytes_accessed = int(2 * xf.size * 2 + pf.size * 2 + B * Np * Cp * 4
                         + (w1t.size + w2t.size + wkt.size + wvt.size + wut.size) * 2
                         + (b1p.size + b2p.size + bup_p.size) * 4)

    out = pl.pallas_call(
        kernel,
        out_shape=jax.ShapeDtypeStruct((B, Np, Cp), jnp.float32),
        grid=(B, 2, n_tiles),
        in_specs=[
            pl.BlockSpec((1, TN, Cp), lambda b, p, t: (b, t, 0)),   # x pixel tile
            pl.BlockSpec((1, Mp, Cp), lambda b, p, t: (b, 0, 0)),   # proxy (per batch)
            wspec((Cp, Kp)), wspec((1, Kp)),                        # f_pixel conv1 (+BN)
            wspec((Kp, Kp)), wspec((1, Kp)),                        # f_pixel conv2 (+BN)
            wspec((Cp, Kp)),                                        # f_object
            wspec((Cp, Kp)),                                        # f_down
            wspec((Kp, Cp)), wspec((1, Cp)),                        # f_up (+BN)
        ],
        # During pass 0 the output index stays pinned at tile 0 (t*p == 0), so no
        # stale tiles are written back; pass 1 then visits each output tile once.
        out_specs=pl.BlockSpec((1, TN, Cp), lambda b, p, t: (b, t * p, 0)),
        scratch_shapes=[
            pltpu.VMEM((1, Mp), jnp.float32),       # running per-object max
            pltpu.VMEM((1, Mp), jnp.float32),       # running per-object sum(exp)
            pltpu.VMEM((Mp, Kp), jnp.bfloat16),     # key   = f_object(proxy)
            pltpu.VMEM((Mp, Kp), jnp.bfloat16),     # value = f_down(proxy)
        ],
        compiler_params=pltpu.CompilerParams(
            dimension_semantics=("parallel", "arbitrary", "arbitrary"),
            vmem_limit_bytes=48 * 1024 * 1024,      # fits v5e/v6e (128 MiB) and v7x (64 MiB)
        ),
        cost_estimate=pl.CostEstimate(
            flops=flops,
            transcendentals=2 * B * Np * Mp,
            bytes_accessed=bytes_accessed),
    )(xf, pf, w1t, b1p, w2t, b2p, wkt, wvt, wut, bup_p)

    out = out[:, :N, :Cin]
    return jnp.transpose(out, (0, 2, 1)).reshape(B, Cin, H, W)


def fold_bn(w, gamma, beta, mean, var, eps=1e-5):
    """Fold eval-mode BatchNorm following a bias-free 1x1 conv into (W, b)."""
    s = gamma / jnp.sqrt(var + eps)
    w_f = w * s[:, None]
    b_f = beta - mean * s
    return w_f.astype(jnp.float32), b_f.reshape(1, -1).astype(jnp.float32)


def make_params(key, in_channels, key_channels):
    ks = jax.random.split(key, 16)
    Cin, Kc = in_channels, key_channels

    def bn_stats(k, c):
        k1, k2, k3, k4 = jax.random.split(k, 4)
        gamma = 1.0 + 0.1 * jax.random.normal(k1, (c,), jnp.float32)
        beta = 0.1 * jax.random.normal(k2, (c,), jnp.float32)
        mean = 0.1 * jax.random.normal(k3, (c,), jnp.float32)
        var = 0.5 + jnp.abs(jax.random.normal(k4, (c,), jnp.float32))
        return gamma, beta, mean, var

    w1_raw = 0.2 * jax.random.normal(ks[0], (Kc, Cin), jnp.float32)
    w2_raw = 0.2 * jax.random.normal(ks[1], (Kc, Kc), jnp.float32)
    wk = 0.2 * jax.random.normal(ks[2], (Kc, Cin), jnp.float32)
    wv = 0.2 * jax.random.normal(ks[3], (Kc, Cin), jnp.float32)
    wup_raw = 0.2 * jax.random.normal(ks[4], (Cin, Kc), jnp.float32)

    w1, b1 = fold_bn(w1_raw, *bn_stats(ks[5], Kc))
    w2, b2 = fold_bn(w2_raw, *bn_stats(ks[6], Kc))
    wup, bup = fold_bn(wup_raw, *bn_stats(ks[7], Cin))

    return (w1, b1, w2, b2, wk.astype(jnp.float32), wv.astype(jnp.float32), wup, bup)


def reference(x, proxy, params, key_channels):
    """Pure-JAX f32 reference mirroring the PyTorch forward (eval BN, scale=1)."""
    (w1, b1, w2, b2, wk, wv, wup, bup) = params
    B, Cin, H, W = x.shape
    N = H * W
    M = proxy.shape[2] * proxy.shape[3]
    xf = jnp.transpose(x.reshape(B, Cin, N), (0, 2, 1))
    pf = jnp.transpose(proxy.reshape(B, Cin, M), (0, 2, 1))
    q = jax.nn.relu(xf @ w1.T + b1)
    q = jax.nn.relu(q @ w2.T + b2)                          # (B, N, Kc)
    k = pf @ wk.T                                           # (B, M, Kc)
    v = pf @ wv.T                                           # (B, M, Kc)
    sim = jnp.einsum("bnk,bmk->bnm", q, k) * (key_channels ** -0.5)
    sim = jax.nn.softmax(sim, axis=1)                       # softmax over pixel axis
    ctx = jnp.einsum("bnm,bmk->bnk", sim, v)                # (B, N, Kc)
    out = jax.nn.relu(ctx @ wup.T + bup)                    # (B, N, Cin)
    return jnp.transpose(out, (0, 2, 1)).reshape(B, Cin, H, W)


if __name__ == "__main__":
    B, Cin, H, W = 2, 4, 16, 16       # x: NCHW
    Hp, Wp = 8, 1                     # proxy regions (e.g. 8 object regions)
    Kc = 32                           # key_channels

    key = jax.random.PRNGKey(0)
    kx, kp, kw = jax.random.split(key, 3)
    x = jax.random.normal(kx, (B, Cin, H, W), jnp.float32)
    proxy = jax.random.normal(kp, (B, Cin, Hp, Wp), jnp.float32)
    params = make_params(kw, Cin, Kc)

    ref = jax.block_until_ready(reference(x, proxy, params, Kc))

    # Exact tile split: N=256 -> two 128-row pixel tiles (two-pass softmax-over-N).
    out = object_attention_block(x, proxy, params, key_channels=Kc, block_n=128)
    out = jax.block_until_ready(out)
    assert out.shape == (B, Cin, H, W)
    assert jnp.allclose(out, ref, atol=2e-2, rtol=2e-2), "mismatch vs JAX reference"

    # Tile size that forces pixel-axis padding + masked softmax statistics.
    out2 = object_attention_block(x, proxy, params, key_channels=Kc, block_n=96)
    out2 = jax.block_until_ready(out2)
    assert jnp.allclose(out2, ref, atol=2e-2, rtol=2e-2), "mismatch (padded-N path)"

    print("KERNEL_OK")
</pallas_src>

<mosaic_0001>
module attributes {stable_mosaic.version = 11 : i64} {
  func.func @_oab_kernel(%arg0: i32, %arg1: i32, %arg2: i32, %arg3: memref<1x128x128xbf16, #tpu.memory_space<vmem>>, %arg4: memref<1x128x128xbf16, #tpu.memory_space<vmem>>, %arg5: memref<128x128xbf16, #tpu.memory_space<vmem>>, %arg6: memref<1x128xf32, #tpu.memory_space<vmem>>, %arg7: memref<128x128xbf16, #tpu.memory_space<vmem>>, %arg8: memref<1x128xf32, #tpu.memory_space<vmem>>, %arg9: memref<128x128xbf16, #tpu.memory_space<vmem>>, %arg10: memref<128x128xbf16, #tpu.memory_space<vmem>>, %arg11: memref<128x128xbf16, #tpu.memory_space<vmem>>, %arg12: memref<1x128xf32, #tpu.memory_space<vmem>>, %arg13: memref<1x128x128xf32, #tpu.memory_space<vmem>>, %arg14: memref<1x128xf32, #tpu.memory_space<vmem>>, %arg15: memref<1x128xf32, #tpu.memory_space<vmem>>, %arg16: memref<128x128xbf16, #tpu.memory_space<vmem>>, %arg17: memref<128x128xbf16, #tpu.memory_space<vmem>>) attributes {dimension_semantics = [#tpu.dimension_semantics<parallel>, #tpu.dimension_semantics<arbitrary>, #tpu.dimension_semantics<arbitrary>], iteration_bounds = array<i64: 2, 2, 2>, scalar_prefetch = 0 : i64, scratch_operands = 4 : i64, tpu.core_type = #tpu.core_type<tc>, window_params = [{transform_indices = @transform_0, window_bounds = array<i64: 1, 128, 128>}, {transform_indices = @transform_1, window_bounds = array<i64: 1, 128, 128>}, {pipeline_mode = #tpu.pipeline_mode<synchronous>, transform_indices = @transform_2, window_bounds = array<i64: 128, 128>}, {pipeline_mode = #tpu.pipeline_mode<synchronous>, transform_indices = @transform_3, window_bounds = array<i64: 1, 128>}, {pipeline_mode = #tpu.pipeline_mode<synchronous>, transform_indices = @transform_4, window_bounds = array<i64: 128, 128>}, {pipeline_mode = #tpu.pipeline_mode<synchronous>, transform_indices = @transform_5, window_bounds = array<i64: 1, 128>}, {pipeline_mode = #tpu.pipeline_mode<synchronous>, transform_indices = @transform_6, window_bounds = array<i64: 128, 128>}, {pipeline_mode = #tpu.pipeline_mode<synchronous>, transform_indices = @transform_7, window_bounds = array<i64: 128, 128>}, {pipeline_mode = #tpu.pipeline_mode<synchronous>, transform_indices = @transform_8, window_bounds = array<i64: 128, 128>}, {pipeline_mode = #tpu.pipeline_mode<synchronous>, transform_indices = @transform_9, window_bounds = array<i64: 1, 128>}, {transform_indices = @transform_10, window_bounds = array<i64: 1, 128, 128>}]} {
    %c0_i32 = arith.constant 0 : i32
    %0 = arith.cmpi eq, %arg1, %c0_i32 : i32
    %c0_i32_0 = arith.constant 0 : i32
    %1 = arith.cmpi eq, %arg2, %c0_i32_0 : i32
    %2 = arith.andi %0, %1 : i1
    %3 = arith.extui %2 : i1 to i32
    %c0_i32_1 = arith.constant 0 : i32
    %4 = arith.cmpi ne, %3, %c0_i32_1 : i32
    scf.if %4 {
      %cst_22 = arith.constant -1.000000e+30 : f32
      %33 = vector.broadcast %cst_22 : f32 to vector<1x128xf32>
      %c0_23 = arith.constant 0 : index
      %c0_24 = arith.constant 0 : index
      %34 = vector.load %arg14[%c0_23, %c0_24] : memref<1x128xf32, #tpu.memory_space<vmem>>, vector<1x128xf32>
      tpu.vector_store %arg14[%c0_23, %c0_24], %33 {strides = array<i32>} : memref<1x128xf32, #tpu.memory_space<vmem>>, vector<1x128xf32>,
      %cst_25 = arith.constant 0.000000e+00 : f32
      %35 = vector.broadcast %cst_25 : f32 to vector<1x128xf32>
      %c0_26 = arith.constant 0 : index
      %c0_27 = arith.constant 0 : index
      %36 = vector.load %arg15[%c0_26, %c0_27] : memref<1x128xf32, #tpu.memory_space<vmem>>, vector<1x128xf32>
      tpu.vector_store %arg15[%c0_26, %c0_27], %35 {strides = array<i32>} : memref<1x128xf32, #tpu.memory_space<vmem>>, vector<1x128xf32>,
      %c0_28 = arith.constant 0 : index
      %c0_29 = arith.constant 0 : index
      %c0_30 = arith.constant 0 : index
      %37 = vector.load %arg4[%c0_28, %c0_29, %c0_30] : memref<1x128x128xbf16, #tpu.memory_space<vmem>>, vector<1x128x128xbf16>
      %38 = vector.shape_cast %37 : vector<1x128x128xbf16> to vector<128x128xbf16>
      %c0_31 = arith.constant 0 : index
      %c0_32 = arith.constant 0 : index
      %39 = vector.load %arg9[%c0_31, %c0_32] : memref<128x128xbf16, #tpu.memory_space<vmem>>, vector<128x128xbf16>
      %cst_33 = arith.constant dense<0.000000e+00> : vector<128x128xf32>
      %40 = tpu.matmul %38, %39, %cst_33 {dimension_numbers = #tpu.dot_dimension_numbers<[1], [0], [0], [1], [0, 0, 1, 1], [], []>} : vector<128x128xbf16>, vector<128x128xbf16>, vector<128x128xf32> -> vector<128x128xf32>
      %41 = arith.truncf %40 : vector<128x128xf32> to vector<128x128xbf16>
      %c0_34 = arith.constant 0 : index
      %c0_35 = arith.constant 0 : index
      %42 = vector.load %arg16[%c0_34, %c0_35] : memref<128x128xbf16, #tpu.memory_space<vmem>>, vector<128x128xbf16>
      tpu.vector_store %arg16[%c0_34, %c0_35], %41 {strides = array<i32>} : memref<128x128xbf16, #tpu.memory_space<vmem>>, vector<128x128xbf16>,
      %c0_36 = arith.constant 0 : index
      %c0_37 = arith.constant 0 : index
      %43 = vector.load %arg10[%c0_36, %c0_37] : memref<128x128xbf16, #tpu.memory_space<vmem>>, vector<128x128xbf16>
      %cst_38 = arith.constant dense<0.000000e+00> : vector<128x128xf32>
      %44 = tpu.matmul %38, %43, %cst_38 {dimension_numbers = #tpu.dot_dimension_numbers<[1], [0], [0], [1], [0, 0, 1, 1], [], []>} : vector<128x128xbf16>, vector<128x128xbf16>, vector<128x128xf32> -> vector<128x128xf32>
      %45 = arith.truncf %44 : vector<128x128xf32> to vector<128x128xbf16>
      %c0_39 = arith.constant 0 : index
      %c0_40 = arith.constant 0 : index
      %46 = vector.load %arg17[%c0_39, %c0_40] : memref<128x128xbf16, #tpu.memory_space<vmem>>, vector<128x128xbf16>
      tpu.vector_store %arg17[%c0_39, %c0_40], %45 {strides = array<i32>} : memref<128x128xbf16, #tpu.memory_space<vmem>>, vector<128x128xbf16>,
    } else {
    }
    %c0 = arith.constant 0 : index
    %c0_2 = arith.constant 0 : index
    %c0_3 = arith.constant 0 : index
    %5 = vector.load %arg3[%c0, %c0_2, %c0_3] : memref<1x128x128xbf16, #tpu.memory_space<vmem>>, vector<1x128x128xbf16>
    %6 = vector.shape_cast %5 : vector<1x128x128xbf16> to vector<128x128xbf16>
    %c0_4 = arith.constant 0 : index
    %c0_5 = arith.constant 0 : index
    %7 = vector.load %arg5[%c0_4, %c0_5] : memref<128x128xbf16, #tpu.memory_space<vmem>>, vector<128x128xbf16>
    %cst = arith.constant dense<0.000000e+00> : vector<128x128xf32>
    %8 = tpu.matmul %6, %7, %cst {dimension_numbers = #tpu.dot_dimension_numbers<[1], [0], [0], [1], [0, 0, 1, 1], [], []>} : vector<128x128xbf16>, vector<128x128xbf16>, vector<128x128xf32> -> vector<128x128xf32>
    %c0_6 = arith.constant 0 : index
    %c0_7 = arith.constant 0 : index
    %9 = vector.load %arg6[%c0_6, %c0_7] : memref<1x128xf32, #tpu.memory_space<vmem>>, vector<1x128xf32>
    %10 = vector.broadcast %9 : vector<1x128xf32> to vector<128x128xf32>
    %11 = arith.addf %8, %10 : vector<128x128xf32>
    %cst_8 = arith.constant 0.000000e+00 : f32
    %12 = vector.broadcast %cst_8 : f32 to vector<128x128xf32>
    %13 = arith.maximumf %11, %12 : vector<128x128xf32>
    %14 = arith.truncf %13 : vector<128x128xf32> to vector<128x128xbf16>
    %c0_9 = arith.constant 0 : index
    %c0_10 = arith.constant 0 : index
    %15 = vector.load %arg7[%c0_9, %c0_10] : memref<128x128xbf16, #tpu.memory_space<vmem>>, vector<128x128xbf16>
    %cst_11 = arith.constant dense<0.000000e+00> : vector<128x128xf32>
    %16 = tpu.matmul %14, %15, %cst_11 {dimension_numbers = #tpu.dot_dimension_numbers<[1], [0], [0], [1], [0, 0, 1, 1], [], []>} : vector<128x128xbf16>, vector<128x128xbf16>, vector<128x128xf32> -> vector<128x128xf32>
    %c0_12 = arith.constant 0 : index
    %c0_13 = arith.constant 0 : index
    %17 = vector.load %arg8[%c0_12, %c0_13] : memref<1x128xf32, #tpu.memory_space<vmem>>, vector<1x128xf32>
    %18 = vector.broadcast %17 : vector<1x128xf32> to vector<128x128xf32>
    %19 = arith.addf %16, %18 : vector<128x128xf32>
    %cst_14 = arith.constant 0.000000e+00 : f32
    %20 = vector.broadcast %cst_14 : f32 to vector<128x128xf32>
    %21 = arith.maximumf %19, %20 : vector<128x128xf32>
    %22 = arith.truncf %21 : vector<128x128xf32> to vector<128x128xbf16>
    %c0_15 = arith.constant 0 : index
    %c0_16 = arith.constant 0 : index
    %23 = vector.load %arg16[%c0_15, %c0_16] : memref<128x128xbf16, #tpu.memory_space<vmem>>, vector<128x128xbf16>
    %cst_17 = arith.constant dense<0.000000e+00> : vector<128x128xf32>
    %24 = tpu.matmul %22, %23, %cst_17 {dimension_numbers = #tpu.dot_dimension_numbers<[1], [1], [0], [0], [0, 0, 1, 0], [], []>} : vector<128x128xbf16>, vector<128x128xbf16>, vector<128x128xf32> -> vector<128x128xf32>
    %cst_18 = arith.constant 0.176776692 : f32
    %25 = vector.broadcast %cst_18 : f32 to vector<128x128xf32>
    %26 = arith.mulf %24, %25 : vector<128x128xf32>
    %c0_i32_19 = arith.constant 0 : i32
    %27 = arith.cmpi eq, %arg1, %c0_i32_19 : i32
    %28 = arith.extui %27 : i1 to i32
    %c0_i32_20 = arith.constant 0 : i32
    %29 = arith.cmpi ne, %28, %c0_i32_20 : i32
    scf.if %29 {
      %c0_22 = arith.constant 0 : index
      %c0_23 = arith.constant 0 : index
      %33 = vector.load %arg14[%c0_22, %c0_23] : memref<1x128xf32, #tpu.memory_space<vmem>>, vector<1x128xf32>
      %cst_24 = arith.constant dense<0xFF800000> : vector<128xf32>
      %34 = vector.multi_reduction <maximumf>, %26, %cst_24 [0] : vector<128x128xf32> to vector<128xf32>
      %35 = vector.shape_cast %34 : vector<128xf32> to vector<1x128xf32>
      %36 = arith.maximumf %33, %35 : vector<1x128xf32>
      %37 = vector.broadcast %36 : vector<1x128xf32> to vector<128x128xf32>
      %38 = arith.subf %26, %37 : vector<128x128xf32>
      %39 = math.exp %38 : vector<128x128xf32>
      %c0_25 = arith.constant 0 : index
      %c0_26 = arith.constant 0 : index
      %40 = vector.load %arg15[%c0_25, %c0_26] : memref<1x128xf32, #tpu.memory_space<vmem>>, vector<1x128xf32>
      %c0_27 = arith.constant 0 : index
      %c0_28 = arith.constant 0 : index
      %41 = vector.load %arg14[%c0_27, %c0_28] : memref<1x128xf32, #tpu.memory_space<vmem>>, vector<1x128xf32>
      %42 = arith.subf %41, %36 : vector<1x128xf32>
      %43 = math.exp %42 : vector<1x128xf32>
      %44 = arith.mulf %40, %43 : vector<1x128xf32>
      %cst_29 = arith.constant dense<0.000000e+00> : vector<128xf32>
      %45 = vector.multi_reduction <add>, %39, %cst_29 [0] : vector<128x128xf32> to vector<128xf32>
      %46 = vector.shape_cast %45 : vector<128xf32> to vector<1x128xf32>
      %47 = arith.addf %44, %46 : vector<1x128xf32>
      %c0_30 = arith.constant 0 : index
      %c0_31 = arith.constant 0 : index
      %48 = vector.load %arg15[%c0_30, %c0_31] : memref<1x128xf32, #tpu.memory_space<vmem>>, vector<1x128xf32>
      tpu.vector_store %arg15[%c0_30, %c0_31], %47 {strides = array<i32>} : memref<1x128xf32, #tpu.memory_space<vmem>>, vector<1x128xf32>,
      %c0_32 = arith.constant 0 : index
      %c0_33 = arith.constant 0 : index
      %49 = vector.load %arg14[%c0_32, %c0_33] : memref<1x128xf32, #tpu.memory_space<vmem>>, vector<1x128xf32>
      tpu.vector_store %arg14[%c0_32, %c0_33], %36 {strides = array<i32>} : memref<1x128xf32, #tpu.memory_space<vmem>>, vector<1x128xf32>,
    } else {
    }
    %c1_i32 = arith.constant 1 : i32
    %30 = arith.cmpi eq, %arg1, %c1_i32 : i32
    %31 = arith.extui %30 : i1 to i32
    %c0_i32_21 = arith.constant 0 : i32
    %32 = arith.cmpi ne, %31, %c0_i32_21 : i32
    scf.if %32 {
      %c0_22 = arith.constant 0 : index
      %c0_23 = arith.constant 0 : index
      %33 = vector.load %arg14[%c0_22, %c0_23] : memref<1x128xf32, #tpu.memory_space<vmem>>, vector<1x128xf32>
      %34 = vector.broadcast %33 : vector<1x128xf32> to vector<128x128xf32>
      %35 = arith.subf %26, %34 : vector<128x128xf32>
      %36 = math.exp %35 : vector<128x128xf32>
      %c0_24 = arith.constant 0 : index
      %c0_25 = arith.constant 0 : index
      %37 = vector.load %arg15[%c0_24, %c0_25] : memref<1x128xf32, #tpu.memory_space<vmem>>, vector<1x128xf32>
      %38 = tpu.reciprocal %37 {approx = true} : vector<1x128xf32> -> vector<1x128xf32>
      %39 = vector.broadcast %38 : vector<1x128xf32> to vector<128x128xf32>
      %40 = arith.mulf %36, %39 : vector<128x128xf32>
      %41 = arith.truncf %40 : vector<128x128xf32> to vector<128x128xbf16>
      %c0_26 = arith.constant 0 : index
      %c0_27 = arith.constant 0 : index
      %42 = vector.load %arg17[%c0_26, %c0_27] : memref<128x128xbf16, #tpu.memory_space<vmem>>, vector<128x128xbf16>
      %cst_28 = arith.constant dense<0.000000e+00> : vector<128x128xf32>
      %43 = tpu.matmul %41, %42, %cst_28 {dimension_numbers = #tpu.dot_dimension_numbers<[1], [0], [0], [1], [0, 0, 1, 1], [], []>} : vector<128x128xbf16>, vector<128x128xbf16>, vector<128x128xf32> -> vector<128x128xf32>
      %44 = arith.truncf %43 : vector<128x128xf32> to vector<128x128xbf16>
      %c0_29 = arith.constant 0 : index
      %c0_30 = arith.constant 0 : index
      %45 = vector.load %arg11[%c0_29, %c0_30] : memref<128x128xbf16, #tpu.memory_space<vmem>>, vector<128x128xbf16>
      %cst_31 = arith.constant dense<0.000000e+00> : vector<128x128xf32>
      %46 = tpu.matmul %44, %45, %cst_31 {dimension_numbers = #tpu.dot_dimension_numbers<[1], [0], [0], [1], [0, 0, 1, 1], [], []>} : vector<128x128xbf16>, vector<128x128xbf16>, vector<128x128xf32> -> vector<128x128xf32>
      %c0_32 = arith.constant 0 : index
      %c0_33 = arith.constant 0 : index
      %47 = vector.load %arg12[%c0_32, %c0_33] : memref<1x128xf32, #tpu.memory_space<vmem>>, vector<1x128xf32>
      %48 = vector.broadcast %47 : vector<1x128xf32> to vector<128x128xf32>
      %49 = arith.addf %46, %48 : vector<128x128xf32>
      %cst_34 = arith.constant 0.000000e+00 : f32
      %50 = vector.broadcast %cst_34 : f32 to vector<128x128xf32>
      %51 = arith.maximumf %49, %50 : vector<128x128xf32>
      %c0_35 = arith.constant 0 : index
      %c0_36 = arith.constant 0 : index
      %c0_37 = arith.constant 0 : index
      %52 = vector.load %arg13[%c0_35, %c0_36, %c0_37] : memref<1x128x128xf32, #tpu.memory_space<vmem>>, vector<1x128x128xf32>
      %53 = vector.shape_cast %52 : vector<1x128x128xf32> to vector<128x128xf32>
      %54 = vector.shape_cast %51 : vector<128x128xf32> to vector<1x128x128xf32>
      tpu.vector_store %arg13[%c0_35, %c0_36, %c0_37], %54 {strides = array<i32>} : memref<1x128x128xf32, #tpu.memory_space<vmem>>, vector<1x128x128xf32>,
    } else {
    }
    return
  }
  func.func @transform_0(%arg0: i32, %arg1: i32, %arg2: i32) -> (i32, i32, i32) {
    %c0_i32 = arith.constant 0 : i32
    %c0_i32_0 = arith.constant 0 : i32
    return %arg0, %arg2, %c0_i32 : i32, i32, i32
  }
  func.func @transform_1(%arg0: i32, %arg1: i32, %arg2: i32) -> (i32, i32, i32) {
    %c0_i32 = arith.constant 0 : i32
    %c0_i32_0 = arith.constant 0 : i32
    %c0_i32_1 = arith.constant 0 : i32
    return %arg0, %c0_i32, %c0_i32_0 : i32, i32, i32
  }
  func.func @transform_2(%arg0: i32, %arg1: i32, %arg2: i32) -> (i32, i32) {
    %c0_i32 = arith.constant 0 : i32
    %c0_i32_0 = arith.constant 0 : i32
    %c0_i32_1 = arith.constant 0 : i32
    return %c0_i32, %c0_i32_0 : i32, i32
  }
  func.func @transform_3(%arg0: i32, %arg1: i32, %arg2: i32) -> (i32, i32) {
    %c0_i32 = arith.constant 0 : i32
    %c0_i32_0 = arith.constant 0 : i32
    %c0_i32_1 = arith.constant 0 : i32
    return %c0_i32, %c0_i32_0 : i32, i32
  }
  func.func @transform_4(%arg0: i32, %arg1: i32, %arg2: i32) -> (i32, i32) {
    %c0_i32 = arith.constant 0 : i32
    %c0_i32_0 = arith.constant 0 : i32
    %c0_i32_1 = arith.constant 0 : i32
    return %c0_i32, %c0_i32_0 : i32, i32
  }
  func.func @transform_5(%arg0: i32, %arg1: i32, %arg2: i32) -> (i32, i32) {
    %c0_i32 = arith.constant 0 : i32
    %c0_i32_0 = arith.constant 0 : i32
    %c0_i32_1 = arith.constant 0 : i32
    return %c0_i32, %c0_i32_0 : i32, i32
  }
  func.func @transform_6(%arg0: i32, %arg1: i32, %arg2: i32) -> (i32, i32) {
    %c0_i32 = arith.constant 0 : i32
    %c0_i32_0 = arith.constant 0 : i32
    %c0_i32_1 = arith.constant 0 : i32
    return %c0_i32, %c0_i32_0 : i32, i32
  }
  func.func @transform_7(%arg0: i32, %arg1: i32, %arg2: i32) -> (i32, i32) {
    %c0_i32 = arith.constant 0 : i32
    %c0_i32_0 = arith.constant 0 : i32
    %c0_i32_1 = arith.constant 0 : i32
    return %c0_i32, %c0_i32_0 : i32, i32
  }
  func.func @transform_8(%arg0: i32, %arg1: i32, %arg2: i32) -> (i32, i32) {
    %c0_i32 = arith.constant 0 : i32
    %c0_i32_0 = arith.constant 0 : i32
    %c0_i32_1 = arith.constant 0 : i32
    return %c0_i32, %c0_i32_0 : i32, i32
  }
  func.func @transform_9(%arg0: i32, %arg1: i32, %arg2: i32) -> (i32, i32) {
    %c0_i32 = arith.constant 0 : i32
    %c0_i32_0 = arith.constant 0 : i32
    %c0_i32_1 = arith.constant 0 : i32
    return %c0_i32, %c0_i32_0 : i32, i32
  }
  func.func @transform_10(%arg0: i32, %arg1: i32, %arg2: i32) -> (i32, i32, i32) {
    %0 = arith.muli %arg2, %arg1 : i32
    %c0_i32 = arith.constant 0 : i32
    %c0_i32_0 = arith.constant 0 : i32
    return %arg0, %0, %c0_i32 : i32, i32, i32
  }
}

</mosaic_0001>

<bundles_post_ra>
// kernel: object_attention_block.1
= control target key start
LH: loop header
LB: loop body
LE: loop exit
PB: predicated region body
PF: predicated region fallthrough
CT: control target
= control target key end

     0   :  { %s2760_s13 = smov 0   ;;  %s2762_s14 = smov 0   ;;  %s3135_s0 = inlined_call_operand.vmem [shape: bf16[2,256,128], index: 0, kind: input, shape index: {}]   ;;  %s3136_s1 = inlined_call_operand.vmem [shape: bf16[2,128,128], index: 1, kind: input, shape index: {}]   ;;  %s3137_s2 = inlined_call_operand.vmem [shape: bf16[128,128], index: 2, kind: input, shape index: {}]   ;;  %s3138_s3 = inlined_call_operand.vmem [shape: f32[1,128], index: 3, kind: input, shape index: {}]   ;;  %s3139_s4 = inlined_call_operand.vmem [shape: bf16[128,128], index: 4, kind: input, shape index: {}]   ;;  %s3140_s5 = inlined_call_operand.vmem [shape: f32[1,128], index: 5, kind: input, shape index: {}]   ;;  %s3141_s6 = inlined_call_operand.vmem [shape: bf16[128,128], index: 6, kind: input, shape index: {}]   ;;  %s3142_s7 = inlined_call_operand.vmem [shape: bf16[128,128], index: 7, kind: input, shape index: {}]   ;;  %s3143_s8 = inlined_call_operand.vmem [shape: bf16[128,128], index: 8, kind: input, shape index: {}]   ;;  %s3144_s9 = inlined_call_operand.vmem [shape: f32[1,128], index: 9, kind: input, shape index: {}]   ;;  %s3145_s10 = inlined_call_operand.vmem [shape: f32[2,256,128], index: 10, kind: output, shape index: {}]  }
   0x1   :  { %s2764_s15 = smov 0   ;;  %s2766_s16 = smov 0  }
   0x2   :  { %s2768_s17 = smov 0   ;;  %s2770_s18 = smov 0  }
   0x3   :  { %s2772_s19 = smov 0  }
   0x4 LB: > { %3148 = sst [smem:[#allocation6_spill]] %s2693_s17  ;;  %s32_s20 = sadd.s32 1, %s2689_s16  ;;  %s2701_s19 = sphi %s2772_s19, %s20_s19   ;;  %s2697_s18 = sphi %s2770_s18, %s3157_s18   ;;  %s2693_s17 = sphi %s2768_s17, %s3156_s17   ;;  %s2689_s16 = sphi %s2766_s16, %s3159_s16   ;;  %s2685_s15 = sphi %s2764_s15, %s3154_s15   ;;  %s2681_s14 = sphi %s2762_s14, %s3153_s14   ;;  %s2677_s13 = sphi %s2760_s13, %s3158_s13  }
   0x5   : > { %3149 = sst [smem:[#allocation7_spill]] %s2697_s18  ;;  %p33_p0 = scmp.ge.s32.totalorder %s32_s20, 2 }
   0x6   : > { %s35_s21 = sadd.s32 1, %s2693_s17  ;;  %p2055_p1 = scmp.ge.s32.totalorder %s2701_s19, 1 }
   0x7   : > { %p352_p2 = scmp.lt.s32.totalorder %s2701_s19, 9  ;;  %s3161_s20 = smov (%p33_p0, %s32_s20), 0 }
   0x8   : > { %3150 = sst [smem:[#allocation8_spill]] %s3161_s20  ;;  %s3163_s21 = smov (!%p33_p0, %s35_s21), %s2693_s17 }
   0x9   : > { %p353_p3 = pnand %p2055_p1, %p352_p2  ;;  %p37_p4 = scmp.ge.s32.totalorder %s3163_s21, 2 }
   0xa   : > { %s39_s22 = sadd.s32 1, %s2697_s18  ;;  %s2056_s23 = sshll.u32 (!%p353_p3), %s2677_s13, 4 }
   0xb   : > { %s3165_s21 = smov (%p37_p4, %s3163_s21), 0  ;;  %s3167_s22 = smov (!%p37_p4, %s39_s22), %s2697_s18 }
   0xc   : > { %3151 = sst [smem:[#allocation9_spill]] %s3165_s21  ;;  %p41_p5 = scmp.ge.s32.totalorder %s3167_s22, 2 }
   0xd   : > { %356 = sbr.rel (%p353_p3) target bundleno = 1594 (0x63a), region = 60  ;;  %p405_p6 = scmp.lt.s32.totalorder (!%p353_p3), %s2685_s15, 1 }
   0xe   : > { %s3169_s22 = smov (%p41_p5, %s3167_s22), 0  ;;  %p407_p7 = scmp.lt.s32.totalorder (!%p353_p3), %s2056_s23, 31 }
   0xf   : > { %3152 = sst [smem:[#allocation10_spill]] %s3169_s22  ;;  %s419_s24 = smul.u32 (!%p353_p3), %s2677_s13, %s2681_s14 }
  0x10   : > { %p432_p9 = scmp.eq.s32.totalorder (!%p353_p3), %s2681_s14, 0  ;;  %p433_p10 = scmp.eq.s32.totalorder (!%p353_p3), %s2677_s13, 0 }
  0x11   : > { %s2061_s12 = sshll.u32 (!%p353_p3), %s419_s24, 4 }
  0x12   : > { %p423_p8 = scmp.lt.s32.totalorder (!%p353_p3), %s2061_s12, 31  ;;  %p434_p11 = pnand (!%p353_p3), %p433_p10, %p432_p9 }
  0x14   : > { %s3171_s15 = smov (!%p405_p6, %s2685_s15), 1  ;;  %s3173_s23 = smov (!%p407_p7, %s2056_s23), 31 }
  0x15   : > { %s2057_s25 = sshll.u32 %s3171_s15, 5  ;;  %s2128_s26 = sshll.u32 %s3171_s15, 6  ;;  %v2523_v0 = vld [vmem:[%s3141_s6] sm:$0xff] (!%p434_p11)   ;;  %v2703_v1 = vmov (!%p434_p11), -1e+30   ;;  %v2704_v2 = vmov (!%p434_p11), 0.0  }
  0x16   : > { %s410_s27 = sadd.s32 %s2057_s25, %s3173_s23  ;;  %s2812_s30 = scalar_lea.vmem %s3136_s1, %s2128_s26  ;;  %438 = vst [vmem:[#allocation2] sm:$0x1] (!%p434_p11), %v2703_v1  ;;  %439 = vst [vmem:[#allocation3] sm:$0x1] (!%p434_p11), %v2704_v2  ;;  %2241 = vmatprep.subr.bf16.mxu0 (!%p434_p11), %v2523_v0  ;;  %v2524_v3 = vld [vmem:[%s3142_s7] sm:$0xff] (!%p434_p11)   ;;  %v2525_v4 = vld [vmem:[%s3141_s6 + $0x8] sm:$0xff] (!%p434_p11)  }
  0x17   : > { %s2058_s11 = sshll.u32 %s410_s27, 2  ;;  %s3175_s12 = smov (!%p423_p8, %s2061_s12), 31  ;;  %2242 = vmatpush3.bf16.msra.mxu0 (!%p434_p11), %v2523_v0  ;;  %2273 = vmatprep.subr.bf16.mxu1 (!%p434_p11), %v2524_v3  ;;  %v2526_v5 = vld [vmem:[%s3142_s7 + $0x8] sm:$0xff] (!%p434_p11)   ;;  %v2527_v6 = vld [vmem:[%s3141_s6 + $0x10] sm:$0xff] (!%p434_p11)   ;;  %v2529_v8 = vld [vmem:[%s3141_s6 + $0x18] sm:$0xff] (!%p434_p11)  }
  0x18   : > { %s2817_s20 = scalar_lea.vmem %s3135_s0, %s2058_s11  ;;  %s426_s18 = sadd.s32 %s2057_s25, %s3175_s12  ;;  %2274 = vmatpush3.bf16.msra.mxu1 (!%p434_p11), %v2524_v3  ;;  %2243 = vmatprep.subr.bf16.mxu0 (!%p434_p11), %v2525_v4  ;;  %v2528_v7 = vld [vmem:[%s3142_s7 + $0x10] sm:$0xff] (!%p434_p11)   ;;  %v2530_v9 = vld [vmem:[%s3142_s7 + $0x18] sm:$0xff] (!%p434_p11)   ;;  %v2531_v10 = vld [vmem:[%s3141_s6 + $0x20] sm:$0xff] (!%p434_p11)  }
  0x19   : > { %s2063_s15 = sshll.u32 %s426_s18, 3  ;;  %437 = sbr.rel (%p434_p11) target bundleno = 297 (0x129), region = 64  ;;  %2275 = vmatprep.subr.bf16.mxu1 (!%p434_p11), %v2526_v5  ;;  %v2532_v11 = vld [vmem:[%s3142_s7 + $0x20] sm:$0xff] (!%p434_p11)   ;;  %v2533_v12 = vld [vmem:[%s3141_s6 + $0x28] sm:$0xff] (!%p434_p11)   ;;  %v2535_v15 = vld [vmem:[%s3141_s6 + $0x30] sm:$0xff] (!%p434_p11)  }
  0x1a   : > { %s2824_s28 = scalar_lea.vmem %s3145_s10, %s2063_s15  ;;  %v2539_v13 = vld [vmem:[%s2812_s30] sm:$0xff] (!%p434_p11)   ;;  %v2534_v14 = vld [vmem:[%s3142_s7 + $0x28] sm:$0xff] (!%p434_p11)   ;;  %v2536_v16 = vld [vmem:[%s3142_s7 + $0x30] sm:$0xff] (!%p434_p11)  }
  0x1b   : > { %2244 = vmatpush3.bf16.msra.mxu0 (!%p434_p11), %v2525_v4  ;;  %2257 = vmatprep.mubr.bf16.mxu0 (!%p434_p11), %v2539_v13  ;;  %v2537_v17 = vld [vmem:[%s3141_s6 + $0x38] sm:$0xff] (!%p434_p11)   ;;  %v2540_v19 = vld [vmem:[%s2812_s30 + $0x8] sm:$0xff] (!%p434_p11)   ;;  %v2541_v20 = vld [vmem:[%s2812_s30 + $0x10] sm:$0xff] (!%p434_p11)  }
  0x1c   : > { %2245 = vmatprep.subr.bf16.mxu0 (!%p434_p11), %v2527_v6  ;;  %2276 = vmatpush3.bf16.msra.mxu1 (!%p434_p11), %v2526_v5  ;;  %v2538_v18 = vld [vmem:[%s3142_s7 + $0x38] sm:$0xff] (!%p434_p11)   ;;  %v2543_v22 = vld [vmem:[%s2812_s30 + $0x20] sm:$0xff] (!%p434_p11)   ;;  %v2544_v23 = vld [vmem:[%s2812_s30 + $0x28] sm:$0xff] (!%p434_p11)  }
  0x1d   : > { %2277 = vmatprep.subr.bf16.mxu1 (!%p434_p11), %v2528_v7  ;;  %2289 = vmatprep.mubr.bf16.mxu1 (!%p434_p11), %v2539_v13  ;;  %v2542_v21 = vld [vmem:[%s2812_s30 + $0x18] sm:$0xff] (!%p434_p11)   ;;  %v2545_v24 = vld [vmem:[%s2812_s30 + $0x30] sm:$0xff] (!%p434_p11)  }
  0x1e   : > { %v2546_v25 = vld [vmem:[%s2812_s30 + $0x38] sm:$0xff] (!%p434_p11)  }
  0x1f   : > { %2246 = vmatpush3.bf16.msra.mxu0 (!%p434_p11), %v2527_v6 }
  0x20   : > { %2247 = vmatprep.subr.bf16.mxu0 %v2529_v8  ;;  %2278 = vmatpush3.bf16.msra.mxu1 %v2528_v7 }
  0x21   : > { %2279 = vmatprep.subr.bf16.mxu1 %v2530_v9 }
  0x23   : > { %2248 = vmatpush3.bf16.msra.mxu0 %v2529_v8 }
  0x24   : > { %2249 = vmatprep.subr.bf16.mxu0 %v2531_v10  ;;  %2280 = vmatpush3.bf16.msra.mxu1 %v2530_v9 }
  0x25   : > { %2281 = vmatprep.subr.bf16.mxu1 %v2532_v11 }
  0x27   : > { %2250 = vmatpush3.bf16.msra.mxu0 %v2531_v10 }
  0x28   : > { %2251 = vmatprep.subr.bf16.mxu0 %v2533_v12  ;;  %2282 = vmatpush3.bf16.msra.mxu1 %v2532_v11 }
  0x29   : > { %2283 = vmatprep.subr.bf16.mxu1 %v2534_v14 }
  0x2b   : > { %2252 = vmatpush3.bf16.msra.mxu0 %v2533_v12 }
  0x2c   : > { %2253 = vmatprep.subr.bf16.mxu0 %v2535_v15  ;;  %2284 = vmatpush3.bf16.msra.mxu1 %v2534_v14 }
  0x2d   : > { %2285 = vmatprep.subr.bf16.mxu1 %v2536_v16 }
  0x2f   : > { %2254 = vmatpush3.bf16.msra.mxu0 %v2535_v15 }
  0x30   : > { %2255 = vmatprep.subr.bf16.mxu0 %v2537_v17  ;;  %2286 = vmatpush3.bf16.msra.mxu1 %v2536_v16 }
  0x31   : > { %2287 = vmatprep.subr.bf16.mxu1 %v2538_v18 }
  0x33   : > { %2256 = vmatpush3.bf16.msra.mxu0 %v2537_v17 }
  0x34   : > { %2288 = vmatpush3.bf16.msra.mxu1 %v2538_v18 }
  0x36   : > { %2258 = vmatmul.mubr.bf16.vlgmr.msra.gmra.mrb[0].mxu0 %v2540_v19 }
  0x37   : > { %2261 = vmatprep.mubr.bf16.mxu0 %v2541_v20  ;;  %2290 = vmatmul.mubr.bf16.vlgmr.msra.gmra.mrb[0].mxu1 %v2540_v19 }
  0x38   : > { %2293 = vmatprep.mubr.bf16.mxu1 %v2541_v20 }
  0x3e   : > { %2262 = vmatmul.mubr.bf16.gmra.mrb[4].mxu0 %v2542_v21 }
  0x3f   : > { %2265 = vmatprep.mubr.bf16.mxu0 %v2543_v22  ;;  %2294 = vmatmul.mubr.bf16.gmra.mrb[4].mxu1 %v2542_v21 }
  0x40   : > { %2297 = vmatprep.mubr.bf16.mxu1 %v2543_v22 }
  0x46   : > { %2266 = vmatmul.mubr.bf16.gmra.mrb[8].mxu0 %v2544_v23 }
  0x47   : > { %2269 = vmatprep.mubr.bf16.mxu0 %v2545_v24  ;;  %2298 = vmatmul.mubr.bf16.gmra.mrb[8].mxu1 %v2544_v23 }
  0x48   : > { %2301 = vmatprep.mubr.bf16.mxu1 %v2545_v24 }
  0x4e   : > { %2270 = vmatmul.mubr.bf16.gmra.mrb[12].mxu0 %v2546_v25 }
  0x4f   : > { %2302 = vmatmul.mubr.bf16.gmra.mrb[12].mxu1 %v2546_v25 }
 0x109   : > { %v2259_v26 = vpop.f32.mrb[0].mxu0 }
 0x10a   : > { %v602_v27 = vpop.f32.mrb[1].mxu0  ;;  %v2291_v28 = vpop.f32.mrb[0].mxu1 }
 0x10b   : > { %v2260_v29 = vpop.f32.mrb[2].mxu0  ;;  %v779_v30 = vpop.f32.mrb[1].mxu1 }
 0x10c   : > { %v666_v31 = vpack.c.bf16 %v2260_v29, %v2259_v26  ;;  %v605_v32 = vpop.f32.mrb[3].mxu0  ;;  %v2292_v33 = vpop.f32.mrb[2].mxu1 }
 0x10d   : > { %v665_v34 = vpack.c.bf16 %v605_v32, %v602_v27  ;;  %v843_v35 = vpack.c.bf16 %v2292_v33, %v2291_v28  ;;  %v782_v36 = vpop.f32.mrb[3].mxu1 }
 0x10e   : > { %674 = vst [vmem:[#allocation4 + $0x8] sm:$0xff] %v666_v31  ;;  %v842_v37 = vpack.c.bf16 %v782_v36, %v779_v30 }
 0x10f   : > { %673 = vst [vmem:[#allocation4] sm:$0xff] %v665_v34  ;;  %851 = vst [vmem:[#allocation5 + $0x8] sm:$0xff] %v843_v35 }
 0x110   : > { %850 = vst [vmem:[#allocation5] sm:$0xff] %v842_v37 }
 0x111   : > { %v2263_v38 = vpop.f32.mrb[4].mxu0 }
 0x112   : > { %v618_v39 = vpop.f32.mrb[5].mxu0  ;;  %v2295_v40 = vpop.f32.mrb[4].mxu1 }
 0x113   : > { %v2264_v41 = vpop.f32.mrb[6].mxu0  ;;  %v795_v42 = vpop.f32.mrb[5].mxu1 }
 0x114   : > { %v668_v43 = vpack.c.bf16 %v2264_v41, %v2263_v38  ;;  %v621_v44 = vpop.f32.mrb[7].mxu0  ;;  %v2296_v45 = vpop.f32.mrb[6].mxu1 }
 0x115   : > { %v667_v46 = vpack.c.bf16 %v621_v44, %v618_v39  ;;  %v845_v47 = vpack.c.bf16 %v2296_v45, %v2295_v40  ;;  %v798_v48 = vpop.f32.mrb[7].mxu1 }
 0x116   : > { %676 = vst [vmem:[#allocation4 + $0x18] sm:$0xff] %v668_v43  ;;  %v844_v49 = vpack.c.bf16 %v798_v48, %v795_v42 }
 0x117   : > { %675 = vst [vmem:[#allocation4 + $0x10] sm:$0xff] %v667_v46  ;;  %853 = vst [vmem:[#allocation5 + $0x18] sm:$0xff] %v845_v47 }
 0x118   : > { %852 = vst [vmem:[#allocation5 + $0x10] sm:$0xff] %v844_v49 }
 0x119   : > { %v2267_v50 = vpop.f32.mrb[8].mxu0 }
 0x11a   : > { %v634_v51 = vpop.f32.mrb[9].mxu0  ;;  %v2299_v52 = vpop.f32.mrb[8].mxu1 }
 0x11b   : > { %v2268_v53 = vpop.f32.mrb[10].mxu0  ;;  %v811_v54 = vpop.f32.mrb[9].mxu1 }
 0x11c   : > { %v670_v55 = vpack.c.bf16 %v2268_v53, %v2267_v50  ;;  %v637_v56 = vpop.f32.mrb[11].mxu0  ;;  %v2300_v57 = vpop.f32.mrb[10].mxu1 }
 0x11d   : > { %v669_v58 = vpack.c.bf16 %v637_v56, %v634_v51  ;;  %v847_v59 = vpack.c.bf16 %v2300_v57, %v2299_v52  ;;  %v814_v60 = vpop.f32.mrb[11].mxu1 }
 0x11e   : > { %678 = vst [vmem:[#allocation4 + $0x28] sm:$0xff] %v670_v55  ;;  %v846_v61 = vpack.c.bf16 %v814_v60, %v811_v54 }
 0x11f   : > { %677 = vst [vmem:[#allocation4 + $0x20] sm:$0xff] %v669_v58  ;;  %855 = vst [vmem:[#allocation5 + $0x28] sm:$0xff] %v847_v59 }
 0x120   : > { %854 = vst [vmem:[#allocation5 + $0x20] sm:$0xff] %v846_v61 }
 0x121   : > { %v2271_v62 = vpop.f32.mrb[12].mxu0 }
 0x122   : > { %v650_v63 = vpop.f32.mrb[13].mxu0  ;;  %v2303_v0 = vpop.f32.mrb[12].mxu1 }
 0x123   : > { %v2272_v1 = vpop.f32.mrb[14].mxu0  ;;  %v827_v2 = vpop.f32.mrb[13].mxu1 }
 0x124   : > { %v672_v3 = vpack.c.bf16 %v2272_v1, %v2271_v62  ;;  %v653_v4 = vpop.f32.mrb[15].mxu0  ;;  %v2304_v5 = vpop.f32.mrb[14].mxu1 }
 0x125   : > { %v671_v6 = vpack.c.bf16 %v653_v4, %v650_v63  ;;  %v849_v7 = vpack.c.bf16 %v2304_v5, %v2303_v0  ;;  %v830_v8 = vpop.f32.mrb[15].mxu1 }
 0x126   : > { %680 = vst [vmem:[#allocation4 + $0x38] sm:$0xff] %v672_v3  ;;  %v848_v9 = vpack.c.bf16 %v830_v8, %v827_v2 }
 0x127   : > { %679 = vst [vmem:[#allocation4 + $0x30] sm:$0xff] %v671_v6  ;;  %857 = vst [vmem:[#allocation5 + $0x38] sm:$0xff] %v849_v7 }
 0x128   : > { %856 = vst [vmem:[#allocation5 + $0x30] sm:$0xff] %v848_v9 }
 0x129 PF: > { %v2547_v10 = vld [vmem:[%s3137_s2] sm:$0xff]   ;;  %v2548_v11 = vld [vmem:[%s3137_s2 + $0x8] sm:$0xff]   ;;  %v2549_v12 = vld [vmem:[%s3137_s2 + $0x10] sm:$0xff]   ;;  %p2114_p12 = scmp.ne.s32.totalorder %s2681_s14, 0 }
 0x12a   : > { %2305 = vmatprep.subr.bf16.mxu1 %v2547_v10  ;;  %v2550_v13 = vld [vmem:[%s3137_s2 + $0x18] sm:$0xff]   ;;  %v2555_v14 = vld [vmem:[%s2817_s20] sm:$0xff]   ;;  %v2552_v16 = vld [vmem:[%s3137_s2 + $0x28] sm:$0xff]  }
 0x12b   : > { %2306 = vmatpush3.bf16.msra.mxu1 %v2547_v10  ;;  %2321 = vmatprep.mubr.bf16.mxu1 %v2555_v14  ;;  %v2551_v15 = vld [vmem:[%s3137_s2 + $0x20] sm:$0xff]   ;;  %v2553_v17 = vld [vmem:[%s3137_s2 + $0x30] sm:$0xff]   ;;  %v2554_v18 = vld [vmem:[%s3137_s2 + $0x38] sm:$0xff]  }
 0x12c   : > { %2307 = vmatprep.subr.bf16.mxu1 %v2548_v11  ;;  %v2563_v19 = vld [vmem:[%s3139_s4] sm:$0xff]   ;;  %v2556_v20 = vld [vmem:[%s2817_s20 + $0x8] sm:$0xff]   ;;  %v2557_v21 = vld [vmem:[%s2817_s20 + $0x10] sm:$0xff]  }
 0x12d   : > { %v2564_v22 = vld [vmem:[%s3139_s4 + $0x8] sm:$0xff]   ;;  %v2565_v23 = vld [vmem:[%s3139_s4 + $0x10] sm:$0xff]   ;;  %v2558_v24 = vld [vmem:[%s2817_s20 + $0x18] sm:$0xff]  }
 0x12e   : > { %v2559_v25 = vld [vmem:[%s2817_s20 + $0x20] sm:$0xff]   ;;  %v2566_v26 = vld [vmem:[%s3139_s4 + $0x18] sm:$0xff]   ;;  %v2560_v28 = vld [vmem:[%s2817_s20 + $0x28] sm:$0xff]  }
 0x12f   : > { %2308 = vmatpush3.bf16.msra.mxu1 %v2548_v11  ;;  %v2567_v27 = vld [vmem:[%s3139_s4 + $0x20] sm:$0xff]   ;;  %v2561_v29 = vld [vmem:[%s2817_s20 + $0x30] sm:$0xff]   ;;  %v2568_v30 = vld [vmem:[%s3139_s4 + $0x28] sm:$0xff]  }
 0x130   : > { %2309 = vmatprep.subr.bf16.mxu1 %v2549_v12  ;;  %v2562_v31 = vld [vmem:[%s2817_s20 + $0x38] sm:$0xff]   ;;  %v2569_v32 = vld [vmem:[%s3139_s4 + $0x30] sm:$0xff]   ;;  %v1306_v34 = vld [vmem:[#allocation4] sm:$0xff] }
 0x131   : > { %v2570_v33 = vld [vmem:[%s3139_s4 + $0x38] sm:$0xff]   ;;  %v1307_v35 = vld [vmem:[#allocation4 + $0x8] sm:$0xff]  ;;  %2369 = vmatprep.subr.bf16.mxu0 %v1306_v34  ;;  %v1310_v38 = vld [vmem:[#allocation4 + $0x20] sm:$0xff] }
 0x132   : > { %2370 = vmatpush3.bf16.xpose.msra.mxu0 %v1306_v34  ;;  %v1308_v36 = vld [vmem:[#allocation4 + $0x10] sm:$0xff]  ;;  %v1309_v37 = vld [vmem:[#allocation4 + $0x18] sm:$0xff]  ;;  %v1311_v39 = vld [vmem:[#allocation4 + $0x28] sm:$0xff] }
 0x133   : > { %2310 = vmatpush3.bf16.msra.mxu1 %v2549_v12  ;;  %2371 = vmatprep.subr.bf16.mxu0 %v1307_v35  ;;  %v1312_v40 = vld [vmem:[#allocation4 + $0x30] sm:$0xff]  ;;  %v2088_v41 = vld [vmem:[%s3138_s3] ss:$0 sm:$0xff] }
 0x134   : > { %2311 = vmatprep.subr.bf16.mxu1 %v2550_v13  ;;  %v1313_v34 = vld [vmem:[#allocation4 + $0x38] sm:$0xff] }
 0x137   : > { %2312 = vmatpush3.bf16.msra.mxu1 %v2550_v13 }
 0x138   : > { %2313 = vmatprep.subr.bf16.mxu1 %v2551_v15 }
 0x13a   : > { %2372 = vmatpush3.bf16.xpose.msra.mxu0 %v1307_v35  ;;  %v2105_v35 = vld [vmem:[%s3140_s5] ss:$0 sm:$0xff] }
 0x13b   : > { %2314 = vmatpush3.bf16.msra.mxu1 %v2551_v15  ;;  %2373 = vmatprep.subr.bf16.mxu0 %v1308_v36 }
 0x13c   : > { %2315 = vmatprep.subr.bf16.mxu1 %v2552_v16 }
 0x13f   : > { %2316 = vmatpush3.bf16.msra.mxu1 %v2552_v16 }
 0x140   : > { %2317 = vmatprep.subr.bf16.mxu1 %v2553_v17 }
 0x142   : > { %2374 = vmatpush3.bf16.xpose.msra.mxu0 %v1308_v36 }
 0x143   : > { %2318 = vmatpush3.bf16.msra.mxu1 %v2553_v17  ;;  %2375 = vmatprep.subr.bf16.mxu0 %v1309_v37 }
 0x144   : > { %2319 = vmatprep.subr.bf16.mxu1 %v2554_v18 }
 0x147   : > { %2320 = vmatpush3.bf16.msra.mxu1 %v2554_v18 }
 0x148   : > { %2337 = vmatprep.subr.bf16.mxu1 %v2563_v19 }
 0x14a   : > { %2322 = vmatmul.mubr.bf16.vlgmr.msra.gmra.mrb[0].mxu1 %v2556_v20  ;;  %2376 = vmatpush3.bf16.xpose.msra.mxu0 %v1309_v37 }
 0x14b   : > { %2325 = vmatprep.mubr.bf16.mxu1 %v2557_v21  ;;  %2338 = vmatpush3.bf16.msra.mxu1 %v2563_v19 }
 0x14c   : > { %2339 = vmatprep.subr.bf16.mxu1 %v2564_v22  ;;  %2377 = vmatprep.subr.bf16.mxu0 %v1310_v38 }
 0x14f   : > { %2340 = vmatpush3.bf16.msra.mxu1 %v2564_v22 }
 0x150   : > { %2341 = vmatprep.subr.bf16.mxu1 %v2565_v23 }
 0x152   : > { %2326 = vmatmul.mubr.bf16.gmra.mrb[4].mxu1 %v2558_v24  ;;  %2378 = vmatpush3.bf16.xpose.msra.mxu0 %v1310_v38 }
 0x153   : > { %2329 = vmatprep.mubr.bf16.mxu1 %v2559_v25  ;;  %2342 = vmatpush3.bf16.msra.mxu1 %v2565_v23 }
 0x154   : > { %2343 = vmatprep.subr.bf16.mxu1 %v2566_v26  ;;  %2379 = vmatprep.subr.bf16.mxu0 %v1311_v39 }
 0x157   : > { %2344 = vmatpush3.bf16.msra.mxu1 %v2566_v26 }
 0x158   : > { %2345 = vmatprep.subr.bf16.mxu1 %v2567_v27 }
 0x15a   : > { %2330 = vmatmul.mubr.bf16.gmra.mrb[8].mxu1 %v2560_v28  ;;  %2380 = vmatpush3.bf16.xpose.msra.mxu0 %v1311_v39 }
 0x15b   : > { %2333 = vmatprep.mubr.bf16.mxu1 %v2561_v29  ;;  %2346 = vmatpush3.bf16.msra.mxu1 %v2567_v27 }
 0x15c   : > { %2347 = vmatprep.subr.bf16.mxu1 %v2568_v30  ;;  %2381 = vmatprep.subr.bf16.mxu0 %v1312_v40 }
 0x15f   : > { %2348 = vmatpush3.bf16.msra.mxu1 %v2568_v30 }
 0x160   : > { %2349 = vmatprep.subr.bf16.mxu1 %v2569_v32 }
 0x162   : > { %2334 = vmatmul.mubr.bf16.gmra.mrb[12].mxu1 %v2562_v31  ;;  %2382 = vmatpush3.bf16.xpose.msra.mxu0 %v1312_v40 }
 0x163   : > { %2350 = vmatpush3.bf16.msra.mxu1 %v2569_v32  ;;  %2383 = vmatprep.subr.bf16.mxu0 %v1313_v34 }
 0x164   : > { %2351 = vmatprep.subr.bf16.mxu1 %v2570_v33 }
 0x167   : > { %2352 = vmatpush3.bf16.msra.mxu1 %v2570_v33 }
 0x16a   : > { %2384 = vmatpush3.bf16.xpose.msra.mxu0 %v1313_v34 }
 0x21d   : > { %v2323_v42 = vpop.f32.mrb[0].mxu1 }
 0x21e   : > { %v1036_v43 = vadd.f32 %v2323_v42, %v2088_v41  ;;  %v1027_v44 = vpop.f32.mrb[1].mxu1 }
 0x21f   : > { %v1028_v45 = vadd.f32 %v2088_v41, %v1027_v44  ;;  %v2324_v46 = vpop.f32.mrb[2].mxu1 }
 0x220   : > { %v1039_v47 = vadd.f32 %v2324_v46, %v2088_v41  ;;  %v1030_v48 = vpop.f32.mrb[3].mxu1  ;;  %v1092_v50 = vmax.f32 %v1036_v43, 0.0 }
 0x221   : > { %v1031_v49 = vadd.f32 %v2088_v41, %v1030_v48  ;;  %v1090_v52 = vmax.f32 %v1028_v45, 0.0 }
 0x222   : > { %v1093_v51 = vmax.f32 %v1039_v47, 0.0 }
 0x223   : > { %v1091_v53 = vmax.f32 %v1031_v49, 0.0 }
 0x224   : > { %v1107_v54 = vpack.c.bf16 %v1093_v51, %v1092_v50 }
 0x225   : > { %v1106_v55 = vpack.c.bf16 %v1091_v53, %v1090_v52  ;;  %v2327_v56 = vpop.f32.mrb[4].mxu1 }
 0x226   : > { %v1052_v57 = vadd.f32 %v2327_v56, %v2088_v41  ;;  %v1043_v58 = vpop.f32.mrb[5].mxu1 }
 0x227   : > { %v1044_v59 = vadd.f32 %v2088_v41, %v1043_v58  ;;  %v2328_v60 = vpop.f32.mrb[6].mxu1  ;;  %2353 = vmatprep.mubr.bf16.mxu1 %v1106_v55 }
 0x228   : > { %v1055_v61 = vadd.f32 %v2328_v60, %v2088_v41  ;;  %v1046_v62 = vpop.f32.mrb[7].mxu1  ;;  %2354 = vmatmul.mubr.bf16.vlgmr.msra.gmra.mrb[16].mxu1 %v1107_v54  ;;  %v1096_v0 = vmax.f32 %v1052_v57, 0.0 }
 0x229   : > { %v1047_v63 = vadd.f32 %v2088_v41, %v1046_v62  ;;  %v1094_v2 = vmax.f32 %v1044_v59, 0.0 }
 0x22a   : > { %v1097_v1 = vmax.f32 %v1055_v61, 0.0 }
 0x22b   : > { %v1095_v3 = vmax.f32 %v1047_v63, 0.0 }
 0x22c   : > { %v1109_v4 = vpack.c.bf16 %v1097_v1, %v1096_v0 }
 0x22d   : > { %v1108_v5 = vpack.c.bf16 %v1095_v3, %v1094_v2  ;;  %v2331_v6 = vpop.f32.mrb[8].mxu1 }
 0x22e   : > { %v1068_v7 = vadd.f32 %v2331_v6, %v2088_v41  ;;  %v1059_v8 = vpop.f32.mrb[9].mxu1 }
 0x22f   : > { %v1060_v9 = vadd.f32 %v2088_v41, %v1059_v8  ;;  %v2332_v10 = vpop.f32.mrb[10].mxu1  ;;  %2357 = vmatprep.mubr.bf16.mxu1 %v1108_v5 }
 0x230   : > { %v1071_v11 = vadd.f32 %v2332_v10, %v2088_v41  ;;  %v1062_v12 = vpop.f32.mrb[11].mxu1  ;;  %2358 = vmatmul.mubr.bf16.gmra.mrb[20].mxu1 %v1109_v4  ;;  %v1100_v14 = vmax.f32 %v1068_v7, 0.0 }
 0x231   : > { %v1063_v13 = vadd.f32 %v2088_v41, %v1062_v12  ;;  %v1098_v16 = vmax.f32 %v1060_v9, 0.0 }
 0x232   : > { %v1101_v15 = vmax.f32 %v1071_v11, 0.0 }
 0x233   : > { %v1099_v17 = vmax.f32 %v1063_v13, 0.0 }
 0x234   : > { %v1111_v18 = vpack.c.bf16 %v1101_v15, %v1100_v14 }
 0x235   : > { %v1110_v19 = vpack.c.bf16 %v1099_v17, %v1098_v16  ;;  %v2335_v20 = vpop.f32.mrb[12].mxu1 }
 0x236   : > { %v1084_v21 = vadd.f32 %v2335_v20, %v2088_v41  ;;  %v1075_v22 = vpop.f32.mrb[13].mxu1 }
 0x237   : > { %v1076_v23 = vadd.f32 %v2088_v41, %v1075_v22  ;;  %v2336_v24 = vpop.f32.mrb[14].mxu1  ;;  %2361 = vmatprep.mubr.bf16.mxu1 %v1110_v19 }
 0x238   : > { %v1087_v25 = vadd.f32 %v2336_v24, %v2088_v41  ;;  %v1078_v26 = vpop.f32.mrb[15].mxu1  ;;  %2362 = vmatmul.mubr.bf16.gmra.mrb[24].mxu1 %v1111_v18  ;;  %v1104_v28 = vmax.f32 %v1084_v21, 0.0 }
 0x239   : > { %v1079_v27 = vadd.f32 %v2088_v41, %v1078_v26  ;;  %v1102_v30 = vmax.f32 %v1076_v23, 0.0 }
 0x23a   : > { %v1105_v29 = vmax.f32 %v1087_v25, 0.0 }
 0x23b   : > { %v1103_v31 = vmax.f32 %v1079_v27, 0.0 }
 0x23c   : > { %v1113_v32 = vpack.c.bf16 %v1105_v29, %v1104_v28 }
 0x23d   : > { %v1112_v33 = vpack.c.bf16 %v1103_v31, %v1102_v30 }
 0x23f   : > { %2365 = vmatprep.mubr.bf16.mxu1 %v1112_v33 }
 0x240   : > { %2366 = vmatmul.mubr.bf16.gmra.mrb[28].mxu1 %v1113_v32 }
 0x2fb   : > { %v2355_v36 = vpop.f32.mrb[16].mxu1 }
 0x2fc   : > { %v1228_v37 = vadd.f32 %v2355_v36, %v2105_v35  ;;  %v1219_v38 = vpop.f32.mrb[17].mxu1 }
 0x2fd   : > { %v1220_v39 = vadd.f32 %v2105_v35, %v1219_v38  ;;  %v2356_v40 = vpop.f32.mrb[18].mxu1 }
 0x2fe   : > { %v1231_v41 = vadd.f32 %v2356_v40, %v2105_v35  ;;  %v1222_v42 = vpop.f32.mrb[19].mxu1  ;;  %v1284_v44 = vmax.f32 %v1228_v37, 0.0 }
 0x2ff   : > { %v1223_v43 = vadd.f32 %v2105_v35, %v1222_v42  ;;  %v1282_v46 = vmax.f32 %v1220_v39, 0.0 }
 0x300   : > { %v1285_v45 = vmax.f32 %v1231_v41, 0.0 }
 0x301   : > { %v1283_v47 = vmax.f32 %v1223_v43, 0.0 }
 0x302   : > { %v1299_v48 = vpack.c.bf16 %v1285_v45, %v1284_v44 }
 0x303   : > { %v2359_v49 = vpop.f32.mrb[20].mxu1  ;;  %v1298_v50 = vpack.c.bf16 %v1283_v47, %v1282_v46 }
 0x304   : > { %v1244_v51 = vadd.f32 %v2359_v49, %v2105_v35  ;;  %v1235_v52 = vpop.f32.mrb[21].mxu1 }
 0x305   : > { %v1236_v53 = vadd.f32 %v2105_v35, %v1235_v52  ;;  %v2360_v54 = vpop.f32.mrb[22].mxu1  ;;  %2385 = vmatprep.mubr.bf16.mxu0 %v1298_v50 }
 0x306   : > { %v1247_v55 = vadd.f32 %v2360_v54, %v2105_v35  ;;  %v1238_v56 = vpop.f32.mrb[23].mxu1  ;;  %2386 = vmatmul.mubr.bf16.vlgmr.msra.gmra.mrb[0].mxu0 %v1299_v48  ;;  %v1288_v58 = vmax.f32 %v1244_v51, 0.0 }
 0x307   : > { %v1239_v57 = vadd.f32 %v2105_v35, %v1238_v56  ;;  %v1286_v60 = vmax.f32 %v1236_v53, 0.0 }
 0x308   : > { %v1289_v59 = vmax.f32 %v1247_v55, 0.0 }
 0x309   : > { %v1287_v61 = vmax.f32 %v1239_v57, 0.0 }
 0x30a   : > { %v1301_v62 = vpack.c.bf16 %v1289_v59, %v1288_v58 }
 0x30b   : > { %v1300_v63 = vpack.c.bf16 %v1287_v61, %v1286_v60  ;;  %v2363_v0 = vpop.f32.mrb[24].mxu1 }
 0x30c   : > { %v1260_v1 = vadd.f32 %v2363_v0, %v2105_v35  ;;  %v1251_v2 = vpop.f32.mrb[25].mxu1 }
 0x30d   : > { %v1252_v3 = vadd.f32 %v2105_v35, %v1251_v2  ;;  %v2364_v4 = vpop.f32.mrb[26].mxu1  ;;  %2389 = vmatprep.mubr.bf16.mxu0 %v1300_v63 }
 0x30e   : > { %v1263_v5 = vadd.f32 %v2364_v4, %v2105_v35  ;;  %v1254_v6 = vpop.f32.mrb[27].mxu1  ;;  %2390 = vmatmul.mubr.bf16.gmra.mrb[4].mxu0 %v1301_v62  ;;  %v1292_v8 = vmax.f32 %v1260_v1, 0.0 }
 0x30f   : > { %v1255_v7 = vadd.f32 %v2105_v35, %v1254_v6  ;;  %v1290_v10 = vmax.f32 %v1252_v3, 0.0 }
 0x310   : > { %v1293_v9 = vmax.f32 %v1263_v5, 0.0 }
 0x311   : > { %v1291_v11 = vmax.f32 %v1255_v7, 0.0 }
 0x312   : > { %v1303_v12 = vpack.c.bf16 %v1293_v9, %v1292_v8 }
 0x313   : > { %v1302_v13 = vpack.c.bf16 %v1291_v11, %v1290_v10  ;;  %v2367_v14 = vpop.f32.mrb[28].mxu1 }
 0x314   : > { %v1276_v15 = vadd.f32 %v2367_v14, %v2105_v35  ;;  %v1267_v16 = vpop.f32.mrb[29].mxu1 }
 0x315   : > { %v1268_v17 = vadd.f32 %v2105_v35, %v1267_v16  ;;  %v2368_v18 = vpop.f32.mrb[30].mxu1  ;;  %2393 = vmatprep.mubr.bf16.mxu0 %v1302_v13  ;;  %v1454_v13 = vlaneseq (!%p2114_p12) }
 0x316   : > { %v1279_v19 = vadd.f32 %v2368_v18, %v2105_v35  ;;  %v1270_v20 = vpop.f32.mrb[31].mxu1  ;;  %2394 = vmatmul.mubr.bf16.gmra.mrb[8].mxu0 %v1303_v12  ;;  %v1296_v22 = vmax.f32 %v1276_v15, 0.0  ;;  %v2993_v18 = vld [vmem:[#allocation2] sm:$0x1] (!%p2114_p12) }
 0x317   : > { %v1271_v21 = vadd.f32 %v2105_v35, %v1270_v20  ;;  %v1294_v24 = vmax.f32 %v1268_v17, 0.0  ;;  %v1455_v16 = vshrl.u32 (!%p2114_p12), %v1454_v13, 7 }
 0x318   : > { %v1297_v23 = vmax.f32 %v1279_v19, 0.0 }
 0x319   : > { %v1295_v25 = vmax.f32 %v1271_v21, 0.0  ;;  %v1456_v20 = vsub.s32 (!%p2114_p12), 0, %v1455_v16 }
 0x31a   : > { %v1305_v26 = vpack.c.bf16 %v1297_v23, %v1296_v22 }
 0x31b   : > { %v1304_v27 = vpack.c.bf16 %v1295_v25, %v1294_v24 }
 0x31d   : > { %2397 = vmatprep.mubr.bf16.mxu0 %v1304_v27 }
 0x31e   : > { %2398 = vmatmul.mubr.bf16.gmra.mrb[12].mxu0 %v1305_v26 }
 0x3d9   : > { %v2387_v28 = vpop.f32.mrb[0].mxu0 }
 0x3da   : > { %v2944_v29 = vmul.f32 0.17677669, %v2387_v28  ;;  %v1348_v30 = vpop.f32.mrb[1].mxu0 }
 0x3db   : > { %v2946_v31 = vmul.f32 0.17677669, %v1348_v30  ;;  %v2388_v32 = vpop.f32.mrb[2].mxu0 }
 0x3dc   : > { %v2948_v33 = vmul.f32 0.17677669, %v2388_v32  ;;  %v1351_v34 = vpop.f32.mrb[3].mxu0 }
 0x3dd   : > { %v2950_v36 = vmul.f32 0.17677669, %v1351_v34 }
 0x3e1   : > { %v2391_v35 = vpop.f32.mrb[4].mxu0 }
 0x3e2   : > { %v2952_v37 = vmul.f32 0.17677669, %v2391_v35  ;;  %v1364_v38 = vpop.f32.mrb[5].mxu0 }
 0x3e3   : > { %v2954_v39 = vmul.f32 0.17677669, %v1364_v38  ;;  %v2392_v40 = vpop.f32.mrb[6].mxu0 }
 0x3e4   : > { %v2956_v41 = vmul.f32 0.17677669, %v2392_v40  ;;  %v1367_v42 = vpop.f32.mrb[7].mxu0  ;;  %v1433_v62 = vmax.f32 (!%p2114_p12), %v2944_v29, %v2952_v37 }
 0x3e5   : > { %v2958_v43 = vmul.f32 0.17677669, %v1367_v42  ;;  %v1431_v60 = vmax.f32 (!%p2114_p12), %v2946_v31, %v2954_v39 }
 0x3e6   : > { %v1434_v63 = vmax.f32 (!%p2114_p12), %v2948_v33, %v2956_v41 }
 0x3e7   : > { %v1432_v61 = vmax.f32 (!%p2114_p12), %v2950_v36, %v2958_v43 }
 0x3e9   : > { %v2395_v44 = vpop.f32.mrb[8].mxu0 }
 0x3ea   : > { %v2960_v45 = vmul.f32 0.17677669, %v2395_v44  ;;  %v1380_v46 = vpop.f32.mrb[9].mxu0 }
 0x3eb   : > { %v2962_v47 = vmul.f32 0.17677669, %v1380_v46  ;;  %v2396_v48 = vpop.f32.mrb[10].mxu0 }
 0x3ec   : > { %v2964_v49 = vmul.f32 0.17677669, %v2396_v48  ;;  %v1383_v50 = vpop.f32.mrb[11].mxu0  ;;  %v1437_v2 = vmax.f32 (!%p2114_p12), %v1433_v62, %v2960_v45 }
 0x3ed   : > { %v2966_v51 = vmul.f32 0.17677669, %v1383_v50  ;;  %v1435_v0 = vmax.f32 (!%p2114_p12), %v1431_v60, %v2962_v47 }
 0x3ee   : > { %v1438_v3 = vmax.f32 (!%p2114_p12), %v1434_v63, %v2964_v49 }
 0x3ef   : > { %1429 = sbr.rel (%p2114_p12) target bundleno = 1098 (0x44a), region = 68  ;;  %v1436_v1 = vmax.f32 (!%p2114_p12), %v1432_v61, %v2966_v51 }
 0x3f1   : > { %v2399_v52 = vpop.f32.mrb[12].mxu0 }
 0x3f2   : > { %v2968_v53 = vmul.f32 0.17677669, %v2399_v52  ;;  %v1396_v54 = vpop.f32.mrb[13].mxu0 }
 0x3f3   : > { %v2970_v55 = vmul.f32 0.17677669, %v1396_v54  ;;  %v2400_v56 = vpop.f32.mrb[14].mxu0 }
 0x3f4   : > { %v2972_v57 = vmul.f32 0.17677669, %v2400_v56  ;;  %v1399_v58 = vpop.f32.mrb[15].mxu0  ;;  %v1441_v6 = vmax.f32 (!%p2114_p12), %v1437_v2, %v2968_v53 }
 0x3f5   : > { %v2974_v59 = vmul.f32 0.17677669, %v1399_v58  ;;  %v1439_v4 = vmax.f32 (!%p2114_p12), %v1435_v0, %v2970_v55 }
 0x3f6   : > { %v1442_v7 = vmax.f32 %v1438_v3, %v2972_v57 }
 0x3f7   : > { %v1440_v5 = vmax.f32 %v1436_v1, %v2974_v59 }
 0x3f8   : > { %v1444_v9 = vmax.f32 %v1441_v6, %v1442_v7 }
 0x3f9   : > { %v1443_v8 = vmax.f32 %v1439_v4, %v1440_v5 }
 0x3fb   : > { %v1445_v10 = vmax.f32 %v1443_v8, %v1444_v9 }
 0x3fd   : > { %v1446_v11 = vrot.slane %v1445_v10, 4 }
 0x3ff   : > { %v1447_v12 = vmax.f32 %v1445_v10, %v1446_v11 }
 0x401   : > { %v1448_v14 = vrot.slane %v1447_v12, 2 }
 0x403   : > { %v1449_v15 = vmax.f32 %v1447_v12, %v1448_v14 }
 0x405   : > { %v1450_v17 = vrot.slane %v1449_v15, 1 }
 0x407   : > { %v1451_v19 = vmax.f32 %v1449_v15, %v1450_v17 }
 0x409   : > { %v2996_v21 = vmax.f32 %v2993_v18, %v1451_v19 }
 0x40b   : > { %v1457_v22 = vrot.slane %v2996_v21, %v1456_v20  ;;  %1535 = vst [vmem:[#allocation2] sm:$0x1] %v2996_v21 }
 0x40d   : > { %v1459_v23 = vsub.f32 %v2946_v31, %v1457_v22  ;;  %v1460_v24 = vsub.f32 %v2950_v36, %v1457_v22  ;;  %v1461_v25 = vsub.f32 %v2944_v29, %v1457_v22  ;;  %v1462_v26 = vsub.f32 %v2948_v33, %v1457_v22 }
 0x40e   : > { %v1463_v27 = vsub.f32 %v2954_v39, %v1457_v22  ;;  %v1464_v34 = vsub.f32 %v2958_v43, %v1457_v22  ;;  %v1465_v38 = vsub.f32 %v2952_v37, %v1457_v22  ;;  %v1466_v42 = vsub.f32 %v2956_v41, %v1457_v22 }
 0x40f   : > { %v1475_v28 = vmul.f32 1.442695, %v1459_v23  ;;  %v1477_v30 = vmul.f32 1.442695, %v1460_v24  ;;  %v1479_v32 = vmul.f32 1.442695, %v1461_v25  ;;  %v1467_v46 = vsub.f32 %v2962_v47, %v1457_v22 }
 0x410   : > { %v1481_v35 = vmul.f32 1.442695, %v1462_v26  ;;  %v1483_v40 = vmul.f32 1.442695, %v1463_v27  ;;  %v1485_v44 = vmul.f32 1.442695, %v1464_v34  ;;  %v1468_v50 = vsub.f32 %v2966_v51, %v1457_v22 }
 0x411   : > { %2571 = vpow2.f32 %v1475_v28  ;;  %v1487_v48 = vmul.f32 1.442695, %v1465_v38  ;;  %v1489_v52 = vmul.f32 1.442695, %v1466_v42  ;;  %v1469_v54 = vsub.f32 %v2960_v45, %v1457_v22 }
 0x412   : > { %2573 = vpow2.f32 %v1477_v30  ;;  %v1491_v56 = vmul.f32 1.442695, %v1467_v46  ;;  %v1470_v61 = vsub.f32 %v2964_v49, %v1457_v22  ;;  %v1493_v62 = vmul.f32 1.442695, %v1468_v50 }
 0x413   : > { %2575 = vpow2.f32 %v1479_v32  ;;  %v1471_v2 = vsub.f32 %v2970_v55, %v1457_v22  ;;  %v1495_v3 = vmul.f32 1.442695, %v1469_v54  ;;  %v1472_v6 = vsub.f32 %v2974_v59, %v1457_v22 }
 0x414   : > { %2577 = vpow2.f32 %v1481_v35  ;;  %v1497_v7 = vmul.f32 1.442695, %v1470_v61  ;;  %v1473_v10 = vsub.f32 %v2968_v53, %v1457_v22  ;;  %v1474_v14 = vsub.f32 %v2972_v57, %v1457_v22 }
 0x415   : > { %2579 = vpow2.f32 %v1483_v40  ;;  %v1499_v11 = vmul.f32 1.442695, %v1471_v2  ;;  %v1501_v15 = vmul.f32 1.442695, %v1472_v6  ;;  %v1508_v22 = vsub.f32 %v2993_v18, %v2996_v21 }
 0x416   : > { %2581 = vpow2.f32 %v1485_v44  ;;  %v1503_v19 = vmul.f32 1.442695, %v1473_v10  ;;  %v1505_v24 = vmul.f32 1.442695, %v1474_v14 }
 0x417   : > { %2583 = vpow2.f32 %v1487_v48  ;;  %v1509_v42 = vmul.f32 1.442695, %v1508_v22 }
 0x418   : > { %2585 = vpow2.f32 %v1489_v52 }
 0x419   : > { %2587 = vpow2.f32 %v1491_v56 }
 0x41a   : > { %2589 = vpow2.f32 %v1493_v62  ;;  %v1507_v62 = vld [vmem:[#allocation3] sm:$0x1] }
 0x41b   : > { %v2572_v58 = vpop.eup %2571  ;;  %2591 = vpow2.f32 %v1495_v3 }
 0x41c   : > { %v2574_v60 = vpop.eup %2573  ;;  %2593 = vpow2.f32 %v1497_v7 }
 0x41d   : > { %v2576_v63 = vpop.eup %2575  ;;  %v1512_v0 = vadd.f32 %v2574_v60, %v2572_v58  ;;  %2595 = vpow2.f32 %v1499_v11 }
 0x41e   : > { %v2578_v1 = vpop.eup %2577  ;;  %2597 = vpow2.f32 %v1501_v15 }
 0x41f   : > { %v1513_v4 = vadd.f32 %v2576_v63, %v1512_v0  ;;  %v2580_v5 = vpop.eup %2579  ;;  %2599 = vpow2.f32 %v1503_v19 }
 0x420   : > { %v2582_v9 = vpop.eup %2581  ;;  %2601 = vpow2.f32 %v1505_v24 }
 0x421   : > { %v1514_v8 = vadd.f32 %v2578_v1, %v1513_v4  ;;  %v2584_v13 = vpop.eup %2583  ;;  %2603 = vpow2.f32 %v1509_v42 }
 0x422   : > { %v2586_v17 = vpop.eup %2585 }
 0x423   : > { %v1515_v12 = vadd.f32 %v2580_v5, %v1514_v8  ;;  %v2588_v23 = vpop.eup %2587 }
 0x424   : > { %v2590_v26 = vpop.eup %2589 }
 0x425   : > { %v1516_v16 = vadd.f32 %v2582_v9, %v1515_v12  ;;  %v2592_v28 = vpop.eup %2591 }
 0x426   : > { %v2594_v32 = vpop.eup %2593 }
 0x427   : > { %v1517_v20 = vadd.f32 %v2584_v13, %v1516_v16  ;;  %v2596_v35 = vpop.eup %2595 }
 0x428   : > { %v2598_v40 = vpop.eup %2597 }
 0x429   : > { %v1518_v25 = vadd.f32 %v2586_v17, %v1517_v20  ;;  %v2600_v46 = vpop.eup %2599 }
 0x42a   : > { %v2602_v50 = vpop.eup %2601 }
 0x42b   : > { %v1519_v27 = vadd.f32 %v2588_v23, %v1518_v25  ;;  %v2604_v61 = vpop.eup %2603 }
 0x42c   : > { %v1511_v0 = vmul.f32 %v2604_v61, %v1507_v62 }
 0x42d   : > { %v1520_v30 = vadd.f32 %v2590_v26, %v1519_v27 }
 0x42f   : > { %v1521_v34 = vadd.f32 %v2592_v28, %v1520_v30 }
 0x431   : > { %v1522_v38 = vadd.f32 %v2594_v32, %v1521_v34 }
 0x433   : > { %v1523_v44 = vadd.f32 %v2596_v35, %v1522_v38 }
 0x435   : > { %v1524_v48 = vadd.f32 %v2598_v40, %v1523_v44 }
 0x437   : > { %v1525_v52 = vadd.f32 %v2600_v46, %v1524_v48 }
 0x439   : > { %v1526_v54 = vadd.f32 %v2602_v50, %v1525_v52 }
 0x43b   : > { %v1527_v56 = vrot.slane %v1526_v54, 4 }
 0x43d   : > { %v1528_v58 = vadd.f32 %v1527_v56, %v1526_v54 }
 0x43f   : > { %v1529_v60 = vrot.slane %v1528_v58, 2 }
 0x441   : > { %v1530_v63 = vadd.f32 %v1529_v60, %v1528_v58 }
 0x443   : > { %v1531_v18 = vrot.slane %v1530_v63, 1 }
 0x445   : > { %v1532_v21 = vadd.f32 %v1531_v18, %v1530_v63 }
 0x447   : > { %v1533_v1 = vadd.f32 %v1532_v21, %v1511_v0 }
 0x449   : > { %1534 = vst [vmem:[#allocation3] sm:$0x1] %v1533_v1 }
 0x44a PF: > { %p2115_p13 = scmp.ne.s32.totalorder %s2681_s14, 1 }
 0x44b   : > { %v1627_v2 = vld [vmem:[#allocation5] sm:$0xff] (!%p2115_p13)  ;;  %v1628_v3 = vld [vmem:[#allocation5 + $0x8] sm:$0xff] (!%p2115_p13)  ;;  %v1629_v4 = vld [vmem:[#allocation5 + $0x10] sm:$0xff] (!%p2115_p13)  ;;  %v1598_v6 = vlaneseq (!%p2115_p13) }
 0x44c   : > { %1539 = sbr.rel (%p2115_p13) target bundleno = 1594 (0x63a), region = 72  ;;  %2401 = vmatprep.subr.bf16.mxu0 (!%p2115_p13), %v1627_v2  ;;  %v3019_v5 = vld [vmem:[#allocation2] ss:$0 sm:$0xff] (!%p2115_p13)  ;;  %v2607_v19 = vld [vmem:[%s3143_s8 + $0x10] sm:$0xff] (!%p2115_p13)   ;;  %v1631_v23 = vld [vmem:[#allocation5 + $0x20] sm:$0xff] (!%p2115_p13) }
 0x44d   : > { %2402 = vmatpush3.bf16.msra.mxu0 (!%p2115_p13), %v1627_v2  ;;  %v1547_v7 = vsub.f32 (!%p2115_p13), %v2946_v31, %v3019_v5  ;;  %v1548_v8 = vsub.f32 (!%p2115_p13), %v2950_v36, %v3019_v5  ;;  %v1549_v10 = vsub.f32 (!%p2115_p13), %v2944_v29, %v3019_v5  ;;  %v1550_v11 = vsub.f32 (!%p2115_p13), %v2948_v33, %v3019_v5  ;;  %v2605_v13 = vld [vmem:[%s3143_s8] sm:$0xff] (!%p2115_p13)   ;;  %v1632_v22 = vld [vmem:[#allocation5 + $0x28] sm:$0xff] (!%p2115_p13)  ;;  %v1633_v50 = vld [vmem:[#allocation5 + $0x30] sm:$0xff] (!%p2115_p13) }
 0x44e   : > { %2403 = vmatprep.subr.bf16.mxu0 (!%p2115_p13), %v1628_v3  ;;  %v1551_v12 = vsub.f32 (!%p2115_p13), %v2954_v39, %v3019_v5  ;;  %v1552_v36 = vsub.f32 (!%p2115_p13), %v2958_v43, %v3019_v5  ;;  %v1630_v15 = vld [vmem:[#allocation5 + $0x18] sm:$0xff] (!%p2115_p13)  ;;  %2433 = vmatprep.subr.bf16.mxu1 (!%p2115_p13), %v2605_v13  ;;  %v1599_v33 = vshrl.u32 (!%p2115_p13), %v1598_v6, 7  ;;  %v2606_v39 = vld [vmem:[%s3143_s8 + $0x8] sm:$0xff] (!%p2115_p13)   ;;  %v1553_v20 = vsub.f32 (!%p2115_p13), %v2952_v37, %v3019_v5 }
 0x44f   : > { %v1563_v14 = vmul.f32 (!%p2115_p13), 1.442695, %v1547_v7  ;;  %v1565_v31 = vmul.f32 (!%p2115_p13), 1.442695, %v1548_v8  ;;  %v1567_v16 = vmul.f32 (!%p2115_p13), 1.442695, %v1549_v10  ;;  %2434 = vmatpush3.bf16.msra.mxu1 (!%p2115_p13), %v2605_v13  ;;  %v1554_v25 = vsub.f32 (!%p2115_p13), %v2956_v41, %v3019_v5 }
 0x450   : > { %v1595_v9 = vld [vmem:[#allocation3] sm:$0x1] (!%p2115_p13)  ;;  %v1569_v29 = vmul.f32 (!%p2115_p13), 1.442695, %v1550_v11  ;;  %v1571_v17 = vmul.f32 (!%p2115_p13), 1.442695, %v1551_v12  ;;  %2435 = vmatprep.subr.bf16.mxu1 (!%p2115_p13), %v2606_v39  ;;  %v1555_v26 = vsub.f32 (!%p2115_p13), %v2962_v47, %v3019_v5  ;;  %v1556_v28 = vsub.f32 (!%p2115_p13), %v2966_v51, %v3019_v5 }
 0x451   : > { %2613 = vrcp.f32 (!%p2115_p13), %v1595_v9  ;;  %2404 = vmatpush3.bf16.msra.mxu0 (!%p2115_p13), %v1628_v3  ;;  %v1573_v43 = vmul.f32 (!%p2115_p13), 1.442695, %v1552_v36  ;;  %v1600_v24 = vsub.s32 (!%p2115_p13), 0, %v1599_v33  ;;  %v2608_v37 = vld [vmem:[%s3143_s8 + $0x18] sm:$0xff] (!%p2115_p13)   ;;  %v1575_v27 = vmul.f32 (!%p2115_p13), 1.442695, %v1553_v20 }
 0x452   : > { %2405 = vmatprep.subr.bf16.mxu0 (!%p2115_p13), %v1629_v4  ;;  %2615 = vpow2.f32 (!%p2115_p13), %v1563_v14  ;;  %v1577_v41 = vmul.f32 (!%p2115_p13), 1.442695, %v1554_v25  ;;  %v1579_v34 = vmul.f32 (!%p2115_p13), 1.442695, %v1555_v26  ;;  %v2609_v47 = vld [vmem:[%s3143_s8 + $0x20] sm:$0xff] (!%p2115_p13)   ;;  %v1557_v42 = vsub.f32 (!%p2115_p13), %v2960_v45, %v3019_v5  ;;  %v2610_v58 = vld [vmem:[%s3143_s8 + $0x28] sm:$0xff] (!%p2115_p13)  }
 0x453   : > { %2617 = vpow2.f32 %v1565_v31  ;;  %2436 = vmatpush3.bf16.msra.mxu1 %v2606_v39  ;;  %v1581_v38 = vmul.f32 1.442695, %v1556_v28  ;;  %v1558_v46 = vsub.f32 %v2964_v49, %v3019_v5  ;;  %v1559_v52 = vsub.f32 %v2970_v55, %v3019_v5  ;;  %v1634_v63 = vld [vmem:[#allocation5 + $0x38] sm:$0xff] }
 0x454   : > { %2619 = vpow2.f32 %v1567_v16  ;;  %2437 = vmatprep.subr.bf16.mxu1 %v2607_v19  ;;  %v1560_v45 = vsub.f32 %v2974_v59, %v3019_v5  ;;  %v1583_v49 = vmul.f32 1.442695, %v1557_v42  ;;  %v2611_v59 = vld [vmem:[%s3143_s8 + $0x30] sm:$0xff]   ;;  %v1561_v3 = vsub.f32 %v2968_v53, %v3019_v5  ;;  %v2612_v28 = vld [vmem:[%s3143_s8 + $0x38] sm:$0xff]  }
 0x455   : > { %2406 = vmatpush3.bf16.msra.mxu0 %v1629_v4  ;;  %2621 = vpow2.f32 %v1569_v29  ;;  %v1585_v62 = vmul.f32 1.442695, %v1558_v46  ;;  %v1587_v55 = vmul.f32 1.442695, %v1559_v52  ;;  %v1562_v6 = vsub.f32 %v2972_v57, %v3019_v5 }
 0x456   : > { %2407 = vmatprep.subr.bf16.mxu0 %v1630_v15  ;;  %2623 = vpow2.f32 %v1571_v17  ;;  %v1589_v21 = vmul.f32 1.442695, %v1560_v45  ;;  %v1591_v12 = vmul.f32 1.442695, %v1561_v3 }
 0x457   : > { %2625 = vpow2.f32 %v1573_v43  ;;  %2438 = vmatpush3.bf16.msra.mxu1 %v2607_v19  ;;  %v1593_v13 = vmul.f32 1.442695, %v1562_v6 }
 0x458   : > { %2439 = vmatprep.subr.bf16.mxu1 %v2608_v37  ;;  %2627 = vpow2.f32 %v1575_v27 }
 0x459   : > { %2408 = vmatpush3.bf16.msra.mxu0 %v1630_v15  ;;  %2629 = vpow2.f32 %v1577_v41 }
 0x45a   : > { %2409 = vmatprep.subr.bf16.mxu0 %v1631_v23  ;;  %2631 = vpow2.f32 %v1579_v34 }
 0x45b   : > { %v2614_v30 = vpop.eup %2613  ;;  %2440 = vmatpush3.bf16.msra.mxu1 %v2608_v37  ;;  %2633 = vpow2.f32 %v1581_v38 }
 0x45c   : > { %v3053_v32 = vrot.slane %v2614_v30, %v1600_v24  ;;  %v2616_v35 = vpop.eup %2615  ;;  %2441 = vmatprep.subr.bf16.mxu1 %v2609_v47  ;;  %2635 = vpow2.f32 %v1583_v49 }
 0x45d   : > { %v2618_v40 = vpop.eup %2617  ;;  %2410 = vmatpush3.bf16.msra.mxu0 %v1631_v23  ;;  %2637 = vpow2.f32 %v1585_v62 }
 0x45e   : > { %v1603_v51 = vmul.f32 %v2616_v35, %v3053_v32  ;;  %2411 = vmatprep.subr.bf16.mxu0 %v1632_v22  ;;  %v1604_v44 = vmul.f32 %v2618_v40, %v3053_v32  ;;  %v2620_v48 = vpop.eup %2619  ;;  %2639 = vpow2.f32 %v1587_v55 }
 0x45f   : > { %v2622_v54 = vpop.eup %2621  ;;  %2442 = vmatpush3.bf16.msra.mxu1 %v2609_v47  ;;  %v1605_v0 = vmul.f32 %v2620_v48, %v3053_v32  ;;  %2641 = vpow2.f32 %v1589_v21 }
 0x460   : > { %v1619_v56 = vpack.c.bf16 %v1604_v44, %v1603_v51  ;;  %v2624_v60 = vpop.eup %2623  ;;  %v1606_v18 = vmul.f32 %v2622_v54, %v3053_v32  ;;  %2443 = vmatprep.subr.bf16.mxu1 %v2610_v58  ;;  %2643 = vpow2.f32 %v1591_v12 }
 0x461   : > { %2412 = vmatpush3.bf16.msra.mxu0 %v1632_v22  ;;  %v2626_v61 = vpop.eup %2625  ;;  %v1607_v1 = vmul.f32 %v2624_v60, %v3053_v32  ;;  %2645 = vpow2.f32 %v1593_v13 }
 0x462   : > { %2413 = vmatprep.subr.bf16.mxu0 %v1633_v50  ;;  %2417 = vmatprep.mubr.bf16.mxu0 %v1619_v56  ;;  %v1608_v2 = vmul.f32 %v2626_v61, %v3053_v32  ;;  %v2628_v4 = vpop.eup %2627  ;;  %v1620_v8 = vpack.c.bf16 %v1606_v18, %v1605_v0 }
 0x463   : > { %2444 = vmatpush3.bf16.msra.mxu1 %v2610_v58  ;;  %v2630_v7 = vpop.eup %2629  ;;  %v1609_v53 = vmul.f32 %v2628_v4, %v3053_v32 }
 0x464   : > { %2445 = vmatprep.subr.bf16.mxu1 %v2611_v59  ;;  %v2632_v9 = vpop.eup %2631  ;;  %v1621_v10 = vpack.c.bf16 %v1608_v2, %v1607_v1  ;;  %v1610_v14 = vmul.f32 %v2630_v7, %v3053_v32 }
 0x465   : > { %2414 = vmatpush3.bf16.msra.mxu0 %v1633_v50  ;;  %v2634_v11 = vpop.eup %2633  ;;  %v1611_v57 = vmul.f32 %v2632_v9, %v3053_v32 }
 0x466   : > { %2415 = vmatprep.subr.bf16.mxu0 %v1634_v63  ;;  %v1612_v5 = vmul.f32 %v2634_v11, %v3053_v32  ;;  %v2636_v31 = vpop.eup %2635  ;;  %v1622_v15 = vpack.c.bf16 %v1610_v14, %v1609_v53 }
 0x467   : > { %2446 = vmatpush3.bf16.msra.mxu1 %v2611_v59  ;;  %v2638_v36 = vpop.eup %2637  ;;  %v1613_v17 = vmul.f32 %v2636_v31, %v3053_v32 }
 0x468   : > { %v2640_v16 = vpop.eup %2639  ;;  %v1623_v29 = vpack.c.bf16 %v1612_v5, %v1611_v57  ;;  %v1614_v39 = vmul.f32 %v2638_v36, %v3053_v32  ;;  %2447 = vmatprep.subr.bf16.mxu1 %v2612_v28 }
 0x469   : > { %2416 = vmatpush3.bf16.msra.mxu0 %v1634_v63  ;;  %v2642_v33 = vpop.eup %2641  ;;  %v1615_v19 = vmul.f32 %v2640_v16, %v3053_v32  ;;  %v2117_v63 = vld [vmem:[%s3144_s9] ss:$0 sm:$0xff] }
 0x46a   : > { %v1616_v43 = vmul.f32 %v2642_v33, %v3053_v32  ;;  %v2644_v20 = vpop.eup %2643  ;;  %v1624_v23 = vpack.c.bf16 %v1614_v39, %v1613_v17 }
 0x46b   : > { %v2646_v24 = vpop.eup %2645  ;;  %v1617_v26 = vmul.f32 %v2644_v20, %v3053_v32  ;;  %2448 = vmatpush3.bf16.msra.mxu1 %v2612_v28 }
 0x46c   : > { %2418 = vmatmul.mubr.bf16.vlgmr.msra.gmra.mrb[0].mxu0 %v1620_v8  ;;  %v1625_v25 = vpack.c.bf16 %v1616_v43, %v1615_v19  ;;  %v1618_v37 = vmul.f32 %v2646_v24, %v3053_v32 }
 0x46d   : > { %2421 = vmatprep.mubr.bf16.mxu0 %v1621_v10 }
 0x46e   : > { %v1626_v27 = vpack.c.bf16 %v1618_v37, %v1617_v26 }
 0x474   : > { %2422 = vmatmul.mubr.bf16.gmra.mrb[4].mxu0 %v1622_v15 }
 0x475   : > { %2425 = vmatprep.mubr.bf16.mxu0 %v1623_v29 }
 0x47c   : > { %2426 = vmatmul.mubr.bf16.gmra.mrb[8].mxu0 %v1624_v23 }
 0x47d   : > { %2429 = vmatprep.mubr.bf16.mxu0 %v1625_v25 }
 0x484   : > { %2430 = vmatmul.mubr.bf16.gmra.mrb[12].mxu0 %v1626_v27 }
 0x53f   : > { %v2419_v30 = vpop.f32.mrb[0].mxu0 }
 0x540   : > { %v1669_v41 = vpop.f32.mrb[1].mxu0 }
 0x541   : > { %v2420_v22 = vpop.f32.mrb[2].mxu0 }
 0x542   : > { %v1733_v34 = vpack.c.bf16 %v2420_v22, %v2419_v30  ;;  %v1672_v47 = vpop.f32.mrb[3].mxu0 }
 0x543   : > { %v1732_v35 = vpack.c.bf16 %v1672_v47, %v1669_v41 }
 0x545   : > { %2449 = vmatprep.mubr.bf16.mxu1 %v1732_v35 }
 0x546   : > { %2450 = vmatmul.mubr.bf16.vlgmr.msra.gmra.mrb[0].mxu1 %v1733_v34 }
 0x547   : > { %v2423_v38 = vpop.f32.mrb[4].mxu0 }
 0x548   : > { %v1685_v40 = vpop.f32.mrb[5].mxu0 }
 0x549   : > { %v2424_v32 = vpop.f32.mrb[6].mxu0 }
 0x54a   : > { %v1735_v51 = vpack.c.bf16 %v2424_v32, %v2423_v38  ;;  %v1688_v42 = vpop.f32.mrb[7].mxu0 }
 0x54b   : > { %v1734_v44 = vpack.c.bf16 %v1688_v42, %v1685_v40 }
 0x54d   : > { %2453 = vmatprep.mubr.bf16.mxu1 %v1734_v44 }
 0x54e   : > { %2454 = vmatmul.mubr.bf16.gmra.mrb[4].mxu1 %v1735_v51 }
 0x54f   : > { %v2427_v46 = vpop.f32.mrb[8].mxu0 }
 0x550   : > { %v1701_v48 = vpop.f32.mrb[9].mxu0 }
 0x551   : > { %v2428_v50 = vpop.f32.mrb[10].mxu0 }
 0x552   : > { %v1737_v52 = vpack.c.bf16 %v2428_v50, %v2427_v46  ;;  %v1704_v54 = vpop.f32.mrb[11].mxu0 }
 0x553   : > { %v1736_v56 = vpack.c.bf16 %v1704_v54, %v1701_v48 }
 0x555   : > { %2457 = vmatprep.mubr.bf16.mxu1 %v1736_v56 }
 0x556   : > { %2458 = vmatmul.mubr.bf16.gmra.mrb[8].mxu1 %v1737_v52 }
 0x557   : > { %v2431_v45 = vpop.f32.mrb[12].mxu0 }
 0x558   : > { %v1717_v58 = vpop.f32.mrb[13].mxu0 }
 0x559   : > { %v2432_v60 = vpop.f32.mrb[14].mxu0 }
 0x55a   : > { %v1739_v49 = vpack.c.bf16 %v2432_v60, %v2431_v45  ;;  %v1720_v61 = vpop.f32.mrb[15].mxu0 }
 0x55b   : > { %v1738_v62 = vpack.c.bf16 %v1720_v61, %v1717_v58 }
 0x55d   : > { %2461 = vmatprep.mubr.bf16.mxu1 %v1738_v62 }
 0x55e   : > { %2462 = vmatmul.mubr.bf16.gmra.mrb[12].mxu1 %v1739_v49 }
 0x619   : > { %v2451_v55 = vpop.f32.mrb[0].mxu1 }
 0x61a   : > { %v1854_v0 = vadd.f32 %v2451_v55, %v2117_v63  ;;  %v1845_v18 = vpop.f32.mrb[1].mxu1 }
 0x61b   : > { %v1846_v21 = vadd.f32 %v2117_v63, %v1845_v18  ;;  %v2452_v59 = vpop.f32.mrb[2].mxu1 }
 0x61c   : > { %v1910_v1 = vmax.f32 %v1854_v0, 0.0  ;;  %v1857_v2 = vadd.f32 %v2452_v59, %v2117_v63  ;;  %v1848_v3 = vpop.f32.mrb[3].mxu1 }
 0x61d   : > { %v1908_v4 = vmax.f32 %v1846_v21, 0.0  ;;  %v1849_v6 = vadd.f32 %v2117_v63, %v1848_v3 }
 0x61e   : > { %1926 = vst [vmem:[%s2824_s28 + $0x10] sm:$0xff] %v1910_v1  ;;  %v1911_v7 = vmax.f32 %v1857_v2, 0.0 }
 0x61f   : > { %1924 = vst [vmem:[%s2824_s28] sm:$0xff] %v1908_v4  ;;  %v1909_v8 = vmax.f32 %v1849_v6, 0.0 }
 0x620   : > { %1927 = vst [vmem:[%s2824_s28 + $0x18] sm:$0xff] %v1911_v7 }
 0x621   : > { %1925 = vst [vmem:[%s2824_s28 + $0x8] sm:$0xff] %v1909_v8  ;;  %v2455_v9 = vpop.f32.mrb[4].mxu1 }
 0x622   : > { %v1870_v10 = vadd.f32 %v2455_v9, %v2117_v63  ;;  %v1861_v11 = vpop.f32.mrb[5].mxu1 }
 0x623   : > { %v1862_v12 = vadd.f32 %v2117_v63, %v1861_v11  ;;  %v2456_v13 = vpop.f32.mrb[6].mxu1 }
 0x624   : > { %v1914_v53 = vmax.f32 %v1870_v10, 0.0  ;;  %v1873_v14 = vadd.f32 %v2456_v13, %v2117_v63  ;;  %v1864_v57 = vpop.f32.mrb[7].mxu1 }
 0x625   : > { %v1912_v5 = vmax.f32 %v1862_v12, 0.0  ;;  %v1865_v31 = vadd.f32 %v2117_v63, %v1864_v57 }
 0x626   : > { %1930 = vst [vmem:[%s2824_s28 + $0x30] sm:$0xff] %v1914_v53  ;;  %v1915_v36 = vmax.f32 %v1873_v14, 0.0 }
 0x627   : > { %1928 = vst [vmem:[%s2824_s28 + $0x20] sm:$0xff] %v1912_v5  ;;  %v1913_v15 = vmax.f32 %v1865_v31, 0.0 }
 0x628   : > { %1931 = vst [vmem:[%s2824_s28 + $0x38] sm:$0xff] %v1915_v36 }
 0x629   : > { %1929 = vst [vmem:[%s2824_s28 + $0x28] sm:$0xff] %v1913_v15  ;;  %v2459_v16 = vpop.f32.mrb[8].mxu1 }
 0x62a   : > { %v1886_v29 = vadd.f32 %v2459_v16, %v2117_v63  ;;  %v1877_v33 = vpop.f32.mrb[9].mxu1 }
 0x62b   : > { %v1878_v17 = vadd.f32 %v2117_v63, %v1877_v33  ;;  %v2460_v39 = vpop.f32.mrb[10].mxu1 }
 0x62c   : > { %v1918_v19 = vmax.f32 %v1886_v29, 0.0  ;;  %v1889_v43 = vadd.f32 %v2460_v39, %v2117_v63  ;;  %v1880_v20 = vpop.f32.mrb[11].mxu1 }
 0x62d   : > { %v1916_v23 = vmax.f32 %v1878_v17, 0.0  ;;  %v1881_v24 = vadd.f32 %v2117_v63, %v1880_v20 }
 0x62e   : > { %1934 = vst [vmem:[%s2824_s28 + $0x50] sm:$0xff] %v1918_v19  ;;  %v1919_v25 = vmax.f32 %v1889_v43, 0.0 }
 0x62f   : > { %1932 = vst [vmem:[%s2824_s28 + $0x40] sm:$0xff] %v1916_v23  ;;  %v1917_v26 = vmax.f32 %v1881_v24, 0.0 }
 0x630   : > { %1935 = vst [vmem:[%s2824_s28 + $0x58] sm:$0xff] %v1919_v25 }
 0x631   : > { %1933 = vst [vmem:[%s2824_s28 + $0x48] sm:$0xff] %v1917_v26  ;;  %v2463_v37 = vpop.f32.mrb[12].mxu1 }
 0x632   : > { %v1902_v27 = vadd.f32 %v2463_v37, %v2117_v63  ;;  %v1893_v28 = vpop.f32.mrb[13].mxu1 }
 0x633   : > { %v1894_v30 = vadd.f32 %v2117_v63, %v1893_v28  ;;  %v2464_v41 = vpop.f32.mrb[14].mxu1 }
 0x634   : > { %v1922_v22 = vmax.f32 %v1902_v27, 0.0  ;;  %v1905_v34 = vadd.f32 %v2464_v41, %v2117_v63  ;;  %v1896_v47 = vpop.f32.mrb[15].mxu1 }
 0x635   : > { %v1920_v35 = vmax.f32 %v1894_v30, 0.0  ;;  %v1897_v38 = vadd.f32 %v2117_v63, %v1896_v47 }
 0x636   : > { %1938 = vst [vmem:[%s2824_s28 + $0x70] sm:$0xff] %v1922_v22  ;;  %v1923_v40 = vmax.f32 %v1905_v34, 0.0 }
 0x637   : > { %1936 = vst [vmem:[%s2824_s28 + $0x60] sm:$0xff] %v1920_v35  ;;  %v1921_v32 = vmax.f32 %v1897_v38, 0.0 }
 0x638   : > { %1939 = vst [vmem:[%s2824_s28 + $0x78] sm:$0xff] %v1923_v40 }
 0x639   : > { %1937 = vst [vmem:[%s2824_s28 + $0x68] sm:$0xff] %v1921_v32 }
 0x63a PF: > { %s20_s19 = sadd.s32 1, %s2701_s19   ;;  %s3153_s14 = sld [smem:[#allocation6_spill]] }
 0x63b   : > { %p17_p0 = scmp.ge.s32.totalorder %s20_s19, 10   ;;  %s3154_s15 = sld [smem:[#allocation7_spill]] }
 0x63c   : > { %s3155_s27 = sld [smem:[#allocation8_spill]]  ;;  %s3156_s17 = sld [smem:[#allocation9_spill]] }
 0x63d   : > { %s3157_s18 = sld [smem:[#allocation10_spill]]  ;;  %s3158_s13 = smov %s2689_s16 }
 0x63e   :  { %19 = sbr.rel (!%p17_p0) target bundleno = 4 (0x4), region = 105 }
 0x642   : > { %s3159_s16 = smov %s3155_s27 }

</bundles_post_ra>
